<compile_context>
chip_gen: v6e
topology: v6e:2x2x1
jax: 0.10.0
libtpu: 0.0.40
codegen_flags: <defaults>
</compile_context>

<pallas_src>
import jax
import jax.numpy as jnp
from jax.experimental import pallas as pl
from jax.experimental.pallas import tpu as pltpu

# ----------------------------- config (small) -----------------------------
B = 1                 # batch (fc(3600,2) after .squeeze() implies B == 1)
C = 3
H = W = 64
PATCH = 16
GRIDHW = H // PATCH       # 4
P = GRIDHW * GRIDHW       # 16 patches (3600 at full 960/16=60 scale)
CPP = C * PATCH * PATCH   # 768
D = 32                    # hidden size
NH = 4                    # attention heads
DH = D // NH              # 8
VOCAB = 64
SEQ = 8
NQ = 1                    # number of text queries (must be 1, see note above)
MLP = 4 * D               # 128
S_REAL = P + 1            # 17 (cls + patches)
S_PAD = 32                # padded to a multiple of 16 (bf16 sublane packing)
LANES = 128               # common lane width of the packed parameter slabs

F32 = jnp.float32
BF16 = jnp.bfloat16

# rows of the packed (N_VEC_ROWS, 128) f32 "vecs" parameter slab
R_LN1_G, R_LN1_B, R_OUT_B, R_LN2_G, R_LN2_B, R_FC2_B = 0, 1, 2, 3, 4, 5
R_POST_G, R_POST_B, R_MRG_G, R_MRG_B, R_TPROJ_B, R_CLSD_B = 6, 7, 8, 9, 10, 11
R_SHIFT_W, R_SCALE_W, R_SHIFT_B, R_SCALE_B = 12, 13, 14, 15
R_QKV_B, R_FC1_B, R_FCB = 16, 17, 18
R_ADD0 = 24                       # rows 24..55  : per-row additive (cls/patch bias + pos), (S_PAD, D)
R_FCW = R_ADD0 + S_PAD            # rows 56..87  : padded final fc weight, (S_PAD, 2) in lanes 0:2
N_VEC_ROWS = R_FCW + S_PAD        # 88 (multiple of 8)

# row offsets of the packed (WS_ROWS, 128) bf16 weight slab
WS_PATCH = 0                      # (CPP, D)
WS_QKV = WS_PATCH + CPP           # (D, 3D)
WS_OUT = WS_QKV + D               # (D, D)
WS_FC1 = WS_OUT + D               # (D, MLP)
WS_FC2 = WS_FC1 + D               # (MLP, D)
WS_CLSD = WS_FC2 + MLP            # (D, D)
WS_TPROJ = WS_CLSD + D            # (D, D)
WS_ROWS = WS_TPROJ + D            # 1056 (multiple of 16)


# ----------------------------- fused Pallas kernel -----------------------------
def _owlv2_fused_kernel(patches_ref, wslab_ref, vecs_ref, pooled_ref, o_ref):
    def vrow(r, width=D):
        return vecs_ref[r:r + 1, 0:width]                 # (1, width) f32, static ref slice

    def wblk(r0, rows, cols):
        return wslab_ref[r0:r0 + rows, 0:cols]            # bf16 weight block, static ref slice

    def ln(x, g, b, eps=1e-5):
        m = jnp.mean(x, axis=-1, keepdims=True)
        v = jnp.mean((x - m) ** 2, axis=-1, keepdims=True)
        return (x - m) * jax.lax.rsqrt(v + eps) * g + b

    def mm(a_bf, w_bf):
        # bf16 MXU inputs, f32 accumulation; surrounding element-wise math stays f32.
        return jnp.dot(a_bf, w_bf, preferred_element_type=F32)

    # -------- vision tower: patch embed + cls token + positional embeddings --------
    # add0 folds {cls_tok+pos[0], patch_b+pos[1:], 0 for pad rows} per row.
    x = mm(patches_ref[...], wblk(WS_PATCH, CPP, D)) \
        + vecs_ref[R_ADD0:R_ADD0 + S_PAD, 0:D]                          # (S_PAD, D) f32

    # -------- encoder layer: pre-LN multi-head self-attention (fused QKV) --------
    h_bf = ln(x, vrow(R_LN1_G), vrow(R_LN1_B)).astype(BF16)             # single bf16 cast of h
    qkv = mm(h_bf, wblk(WS_QKV, D, 3 * D)) \
        + vecs_ref[R_QKV_B:R_QKV_B + 1, 0:3 * D]                        # (S_PAD, 3D) f32
    qkv_bf = qkv.astype(BF16)                                           # single cast for all heads

    kmask = jax.lax.broadcasted_iota(jnp.int32, (S_PAD, S_PAD), 1) < S_REAL
    inv_sqrt_dh = 1.0 / (DH ** 0.5)
    heads = []
    for hh in range(NH):                                                # static unroll over heads
        qh = qkv_bf[:, hh * DH:(hh + 1) * DH]
        kh = qkv_bf[:, D + hh * DH:D + (hh + 1) * DH]
        vh = qkv_bf[:, 2 * D + hh * DH:2 * D + (hh + 1) * DH]
        s = jax.lax.dot_general(qh, kh, (((1,), (1,)), ((), ())),       # q @ k^T, no materialized T
                                preferred_element_type=F32) * inv_sqrt_dh
        s = jnp.where(kmask, s, -1e30)                                  # mask padded key positions
        s = s - jnp.max(s, axis=-1, keepdims=True)
        p = jnp.exp(s)
        p = p * pl.reciprocal(jnp.sum(p, axis=-1, keepdims=True), approx=True)
        heads.append(mm(p.astype(BF16), vh))                            # (S_PAD, DH) f32
    attn = jnp.concatenate(heads, axis=-1)                              # (S_PAD, D)
    x = x + mm(attn.astype(BF16), wblk(WS_OUT, D, D)) + vrow(R_OUT_B)   # single out-proj matmul

    # -------- encoder layer: MLP + post-LN --------
    h2_bf = ln(x, vrow(R_LN2_G), vrow(R_LN2_B)).astype(BF16)
    m1 = jax.nn.gelu(mm(h2_bf, wblk(WS_FC1, D, MLP))
                     + vecs_ref[R_FC1_B:R_FC1_B + 1, 0:MLP])            # (S_PAD, MLP)
    x = x + mm(m1.astype(BF16), wblk(WS_FC2, MLP, D)) + vrow(R_FC2_B)
    x = ln(x, vrow(R_POST_G), vrow(R_POST_B))

    # -------- merged image embeds: patch_tok * cls_tok, LN --------
    merged = ln(x * x[0:1, :], vrow(R_MRG_G), vrow(R_MRG_B))            # (S_PAD, D)

    # -------- text tower: projection of the (XLA-pooled) query --------
    pooled_bf = pooled_ref[0:1, 0:D].astype(BF16)
    query = mm(pooled_bf, wblk(WS_TPROJ, D, D)) + vrow(R_TPROJ_B)       # (1, D)

    # -------- OwlV2 class-prediction head --------
    cls_emb = mm(merged.astype(BF16), wblk(WS_CLSD, D, D)) + vrow(R_CLSD_B)   # (S_PAD, D)
    shift = (jnp.sum(merged * vrow(R_SHIFT_W), axis=-1, keepdims=True)        # D->1 as VPU reduction
             + vecs_ref[R_SHIFT_B:R_SHIFT_B + 1, 0:1])
    s0 = (jnp.sum(merged * vrow(R_SCALE_W), axis=-1, keepdims=True)
          + vecs_ref[R_SCALE_B:R_SCALE_B + 1, 0:1])
    scl = jnp.where(s0 > 0, s0 + 1.0, jnp.exp(s0))                      # elu(s0) + 1

    img_n = cls_emb * jax.lax.rsqrt(jnp.sum(cls_emb * cls_emb, axis=-1, keepdims=True) + 1e-6)
    qry_n = query * jax.lax.rsqrt(jnp.sum(query * query, axis=-1, keepdims=True) + 1e-6)
    sim = jnp.sum(img_n * qry_n, axis=-1, keepdims=True)                # (S_PAD, 1)
    pred = (sim + shift) * scl                                          # (S_PAD, 1)

    # -------- `.squeeze()` then fc(num_patches -> 2); pad/cls rows carry zero weight --------
    out = (jnp.sum(pred * vecs_ref[R_FCW:R_FCW + S_PAD, :], axis=0, keepdims=True)
           + vecs_ref[R_FCB:R_FCB + 1, :])                              # (1, 128) lane-dense
    o_ref[...] = jnp.broadcast_to(out, (8, LANES))


# ----------------------------- glue (plain JAX) -----------------------------
def im2col(pixel_values):
    """NCHW -> (B*P, C*ph*pw): one row per non-overlapping 16x16 patch."""
    b, c, h, w = pixel_values.shape
    x = pixel_values.reshape(b, c, GRIDHW, PATCH, GRIDHW, PATCH)
    x = x.transpose(0, 2, 4, 1, 3, 5)
    return x.reshape(b * GRIDHW * GRIDHW, c * PATCH * PATCH)


def init_params(key):
    ks = iter(jax.random.split(key, 32))
    def w(shape, scale=0.02):
        return (scale * jax.random.normal(next(ks), shape)).astype(F32)
    p = {}
    p["patch_w"] = w((CPP, D)); p["patch_b"] = jnp.zeros((D,), F32)
    p["cls_tok"] = w((1, D)); p["pos_emb"] = w((S_REAL, D))
    p["v_ln1_g"] = jnp.ones((D,), F32); p["v_ln1_b"] = jnp.zeros((D,), F32)
    p["v_qkv_w"] = w((D, 3 * D)); p["v_qkv_b"] = jnp.zeros((3 * D,), F32)
    p["v_out_w"] = w((D, D)); p["v_out_b"] = jnp.zeros((D,), F32)
    p["v_ln2_g"] = jnp.ones((D,), F32); p["v_ln2_b"] = jnp.zeros((D,), F32)
    p["v_fc1_w"] = w((D, MLP)); p["v_fc1_b"] = jnp.zeros((MLP,), F32)
    p["v_fc2_w"] = w((MLP, D)); p["v_fc2_b"] = jnp.zeros((D,), F32)
    p["v_post_ln_g"] = jnp.ones((D,), F32); p["v_post_ln_b"] = jnp.zeros((D,), F32)
    p["merged_ln_g"] = jnp.ones((D,), F32); p["merged_ln_b"] = jnp.zeros((D,), F32)
    p["tok_emb"] = w((VOCAB, D)); p["txt_pos"] = w((SEQ, D))
    p["txt_proj_w"] = w((D, D)); p["txt_proj_b"] = jnp.zeros((D,), F32)
    p["cls_dense_w"] = w((D, D)); p["cls_dense_b"] = jnp.zeros((D,), F32)
    p["shift_w"] = w((D, 1)); p["shift_b"] = jnp.zeros((1,), F32)
    p["scale_w"] = w((D, 1)); p["scale_b"] = jnp.zeros((1,), F32)
    p["fc_w"] = w((P, 2)); p["fc_b"] = jnp.zeros((2,), F32)
    return p


def pack_params(p):
    """Fold / repack weights into the two slabs the fused kernel consumes (done once)."""
    # per-row additive: row0 = cls+pos[0]; rows 1..P = patch_b+pos; pad rows = 0
    add0 = jnp.concatenate(
        [p["cls_tok"] + p["pos_emb"][0:1],
         p["patch_b"][None, :] + p["pos_emb"][1:S_REAL],
         jnp.zeros((S_PAD - S_REAL, D), F32)], axis=0)                   # (S_PAD, D)

    vecs = jnp.zeros((N_VEC_ROWS, LANES), F32)
    def setrow(v, r, vec):
        return v.at[r, :vec.shape[0]].set(vec)
    vecs = setrow(vecs, R_LN1_G, p["v_ln1_g"]); vecs = setrow(vecs, R_LN1_B, p["v_ln1_b"])
    vecs = setrow(vecs, R_OUT_B, p["v_out_b"])
    vecs = setrow(vecs, R_LN2_G, p["v_ln2_g"]); vecs = setrow(vecs, R_LN2_B, p["v_ln2_b"])
    vecs = setrow(vecs, R_FC2_B, p["v_fc2_b"])
    vecs = setrow(vecs, R_POST_G, p["v_post_ln_g"]); vecs = setrow(vecs, R_POST_B, p["v_post_ln_b"])
    vecs = setrow(vecs, R_MRG_G, p["merged_ln_g"]); vecs = setrow(vecs, R_MRG_B, p["merged_ln_b"])
    vecs = setrow(vecs, R_TPROJ_B, p["txt_proj_b"]); vecs = setrow(vecs, R_CLSD_B, p["cls_dense_b"])
    vecs = setrow(vecs, R_SHIFT_W, p["shift_w"][:, 0]); vecs = setrow(vecs, R_SCALE_W, p["scale_w"][:, 0])
    vecs = vecs.at[R_SHIFT_B, 0].set(p["shift_b"][0]).at[R_SCALE_B, 0].set(p["scale_b"][0])
    vecs = setrow(vecs, R_QKV_B, p["v_qkv_b"])
    vecs = setrow(vecs, R_FC1_B, p["v_fc1_b"])
    vecs = setrow(vecs, R_FCB, p["fc_b"])
    vecs = vecs.at[R_ADD0:R_ADD0 + S_PAD, :D].set(add0)
    # final fc weight in the (S_PAD)-row layout: row 0 (cls) and pad rows stay 0
    vecs = vecs.at[R_FCW + 1:R_FCW + S_REAL, :2].set(p["fc_w"])

    # single bf16 weight slab, zero-padded to 128 lanes; sliced statically in-kernel
    wslab = jnp.zeros((WS_ROWS, LANES), F32)
    wslab = wslab.at[WS_PATCH:WS_PATCH + CPP, :D].set(p["patch_w"])
    wslab = wslab.at[WS_QKV:WS_QKV + D, :3 * D].set(p["v_qkv_w"])
    wslab = wslab.at[WS_OUT:WS_OUT + D, :D].set(p["v_out_w"])
    wslab = wslab.at[WS_FC1:WS_FC1 + D, :MLP].set(p["v_fc1_w"])
    wslab = wslab.at[WS_FC2:WS_FC2 + MLP, :D].set(p["v_fc2_w"])
    wslab = wslab.at[WS_CLSD:WS_CLSD + D, :D].set(p["cls_dense_w"])
    wslab = wslab.at[WS_TPROJ:WS_TPROJ + D, :D].set(p["txt_proj_w"])

    return dict(wslab=wslab.astype(BF16), vecs=vecs,
                tok_emb=p["tok_emb"], txt_pos=p["txt_pos"])


@jax.jit
def forward(packed, pixel_values, input_ids, attention_mask):
    # TODO(synk): Owlv2Processor (image resize/normalize, tokenization) and pretrained
    # checkpoint loading have no Pallas equivalent; pre-processed tensors + synthetic
    # weights stand in.  The token-embedding gather + masked mean-pool stay in XLA
    # (they fuse for free there); everything else runs inside one fused Pallas kernel.
    patches = im2col(pixel_values)                                            # (P, CPP)
    patches_pad = jnp.pad(patches, ((1, S_PAD - S_REAL), (0, 0))).astype(BF16)  # (S_PAD, CPP)

    tok = jnp.take(packed["tok_emb"], input_ids[0], axis=0) + packed["txt_pos"]  # (SEQ, D)
    tm = attention_mask[0].astype(F32)[:, None]                                   # (SEQ, 1)
    pooled = jnp.sum(tok * tm, axis=0, keepdims=True) / jnp.maximum(jnp.sum(tm), 1.0)  # (1, D)
    pooled_pad = jnp.zeros((8, LANES), F32).at[0:1, :D].set(pooled)

    vmem_spec = pl.BlockSpec(memory_space=pltpu.MemorySpace.VMEM)
    out = pl.pallas_call(
        _owlv2_fused_kernel,
        out_shape=jax.ShapeDtypeStruct((8, LANES), F32),
        in_specs=[vmem_spec, vmem_spec, vmem_spec, vmem_spec],   # no grid: single invocation,
        out_specs=vmem_spec,                                      # full-array VMEM blocks
    )(patches_pad, packed["wslab"], packed["vecs"], pooled_pad)
    return out[0, :2]


# ----------------------------- driver -----------------------------
if __name__ == "__main__":
    key = jax.random.PRNGKey(0)
    k_par, k_img, k_txt = jax.random.split(key, 3)

    params = init_params(k_par)
    packed = pack_params(params)
    pixel_values = jax.random.normal(k_img, (B, C, H, W), F32)              # NCHW
    input_ids = jax.random.randint(k_txt, (NQ, SEQ), 0, VOCAB, jnp.int32)
    attention_mask = jnp.array([[1, 1, 1, 1, 1, 1, 0, 0]], jnp.int32)       # padded query

    out = forward(packed, pixel_values, input_ids, attention_mask)
    jax.block_until_ready(out)
    assert out.shape == (2,) and out.dtype == jnp.float32
    assert bool(jnp.all(jnp.isfinite(out)))
    print("KERNEL_OK")
</pallas_src>

<mosaic_0001>
module attributes {stable_mosaic.version = 11 : i64} {
  func.func @_owlv2_fused_kernel(%arg0: memref<32x768xbf16, #tpu.memory_space<vmem>>, %arg1: memref<1056x128xbf16, #tpu.memory_space<vmem>>, %arg2: memref<88x128xf32, #tpu.memory_space<vmem>>, %arg3: memref<8x128xf32, #tpu.memory_space<vmem>>, %arg4: memref<8x128xf32, #tpu.memory_space<vmem>>) attributes {dimension_semantics = [], scalar_prefetch = 0 : i64, scratch_operands = 0 : i64, tpu.core_type = #tpu.core_type<tc>} {
    %c0 = arith.constant 0 : index
    %c0_0 = arith.constant 0 : index
    %0 = vector.load %arg0[%c0, %c0_0] : memref<32x768xbf16, #tpu.memory_space<vmem>>, vector<32x768xbf16>
    %c0_1 = arith.constant 0 : index
    %c0_2 = arith.constant 0 : index
    %1 = vector.load %arg1[%c0_1, %c0_2] : memref<1056x128xbf16, #tpu.memory_space<vmem>>, vector<768x32xbf16>
    %cst = arith.constant dense<0.000000e+00> : vector<32x32xf32>
    %2 = tpu.matmul %0, %1, %cst {dimension_numbers = #tpu.dot_dimension_numbers<[1], [0], [0], [1], [0, 0, 1, 1], [], []>} : vector<32x768xbf16>, vector<768x32xbf16>, vector<32x32xf32> -> vector<32x32xf32>
    %c24 = arith.constant 24 : index
    %c0_3 = arith.constant 0 : index
    %3 = vector.load %arg2[%c24, %c0_3] : memref<88x128xf32, #tpu.memory_space<vmem>>, vector<32x32xf32>
    %4 = arith.addf %2, %3 : vector<32x32xf32>
    %c0_4 = arith.constant 0 : index
    %c0_5 = arith.constant 0 : index
    %5 = vector.load %arg2[%c0_4, %c0_5] : memref<88x128xf32, #tpu.memory_space<vmem>>, vector<1x32xf32>
    %c1 = arith.constant 1 : index
    %c0_6 = arith.constant 0 : index
    %6 = vector.load %arg2[%c1, %c0_6] : memref<88x128xf32, #tpu.memory_space<vmem>>, vector<1x32xf32>
    %cst_7 = arith.constant dense<0.000000e+00> : vector<32xf32>
    %7 = vector.multi_reduction <add>, %4, %cst_7 [1] : vector<32x32xf32> to vector<32xf32>
    %8 = vector.shape_cast %7 : vector<32xf32> to vector<32x1xf32>
    %cst_8 = arith.constant 3.200000e+01 : f32
    %9 = vector.broadcast %cst_8 : f32 to vector<32x1xf32>
    %10 = arith.divf %8, %9 : vector<32x1xf32>
    %11 = vector.broadcast %10 : vector<32x1xf32> to vector<32x32xf32>
    %12 = arith.subf %4, %11 : vector<32x32xf32>
    %13 = arith.mulf %12, %12 : vector<32x32xf32>
    %cst_9 = arith.constant dense<0.000000e+00> : vector<32xf32>
    %14 = vector.multi_reduction <add>, %13, %cst_9 [1] : vector<32x32xf32> to vector<32xf32>
    %15 = vector.shape_cast %14 : vector<32xf32> to vector<32x1xf32>
    %cst_10 = arith.constant 3.200000e+01 : f32
    %16 = vector.broadcast %cst_10 : f32 to vector<32x1xf32>
    %17 = arith.divf %15, %16 : vector<32x1xf32>
    %18 = vector.broadcast %10 : vector<32x1xf32> to vector<32x32xf32>
    %19 = arith.subf %4, %18 : vector<32x32xf32>
    %cst_11 = arith.constant 9.99999974E-6 : f32
    %20 = vector.broadcast %cst_11 : f32 to vector<32x1xf32>
    %21 = arith.addf %17, %20 : vector<32x1xf32>
    %22 = math.rsqrt %21 : vector<32x1xf32>
    %23 = vector.broadcast %22 : vector<32x1xf32> to vector<32x32xf32>
    %24 = arith.mulf %19, %23 : vector<32x32xf32>
    %25 = vector.broadcast %5 : vector<1x32xf32> to vector<32x32xf32>
    %26 = arith.mulf %24, %25 : vector<32x32xf32>
    %27 = vector.broadcast %6 : vector<1x32xf32> to vector<32x32xf32>
    %28 = arith.addf %26, %27 : vector<32x32xf32>
    %29 = arith.truncf %28 : vector<32x32xf32> to vector<32x32xbf16>
    %c768 = arith.constant 768 : index
    %c0_12 = arith.constant 0 : index
    %30 = vector.load %arg1[%c768, %c0_12] : memref<1056x128xbf16, #tpu.memory_space<vmem>>, vector<32x96xbf16>
    %cst_13 = arith.constant dense<0.000000e+00> : vector<32x96xf32>
    %31 = tpu.matmul %29, %30, %cst_13 {dimension_numbers = #tpu.dot_dimension_numbers<[1], [0], [0], [1], [0, 0, 1, 1], [], []>} : vector<32x32xbf16>, vector<32x96xbf16>, vector<32x96xf32> -> vector<32x96xf32>
    %c16 = arith.constant 16 : index
    %c0_14 = arith.constant 0 : index
    %32 = vector.load %arg2[%c16, %c0_14] : memref<88x128xf32, #tpu.memory_space<vmem>>, vector<1x96xf32>
    %33 = vector.broadcast %32 : vector<1x96xf32> to vector<32x96xf32>
    %34 = arith.addf %31, %33 : vector<32x96xf32>
    %35 = arith.truncf %34 : vector<32x96xf32> to vector<32x96xbf16>
    %36 = tpu.iota {dimensions = array<i32: 1>} : vector<32x32xi32>
    %c17_i32 = arith.constant 17 : i32
    %37 = vector.broadcast %c17_i32 : i32 to vector<32x32xi32>
    %38 = arith.cmpi slt, %36, %37 : vector<32x32xi32>
    %39 = vector.extract_strided_slice %35 {offsets = [0, 0], sizes = [32, 8], strides = [1, 1]} : vector<32x96xbf16> to vector<32x8xbf16>
    %40 = vector.extract_strided_slice %35 {offsets = [0, 32], sizes = [32, 8], strides = [1, 1]} : vector<32x96xbf16> to vector<32x8xbf16>
    %41 = vector.extract_strided_slice %35 {offsets = [0, 64], sizes = [32, 8], strides = [1, 1]} : vector<32x96xbf16> to vector<32x8xbf16>
    %cst_15 = arith.constant dense<0.000000e+00> : vector<32x32xf32>
    %42 = tpu.matmul %39, %40, %cst_15 {dimension_numbers = #tpu.dot_dimension_numbers<[1], [1], [0], [0], [0, 0, 1, 0], [], []>} : vector<32x8xbf16>, vector<32x8xbf16>, vector<32x32xf32> -> vector<32x32xf32>
    %cst_16 = arith.constant 0.353553385 : f32
    %43 = vector.broadcast %cst_16 : f32 to vector<32x32xf32>
    %44 = arith.mulf %42, %43 : vector<32x32xf32>
    %cst_17 = arith.constant -1.000000e+30 : f32
    %45 = vector.broadcast %cst_17 : f32 to vector<32x32xf32>
    %46 = arith.select %38, %44, %45 : vector<32x32xi1>, vector<32x32xf32>
    %cst_18 = arith.constant dense<0xFF800000> : vector<32xf32>
    %47 = vector.multi_reduction <maximumf>, %46, %cst_18 [1] : vector<32x32xf32> to vector<32xf32>
    %48 = vector.shape_cast %47 : vector<32xf32> to vector<32x1xf32>
    %49 = vector.broadcast %48 : vector<32x1xf32> to vector<32x32xf32>
    %50 = arith.subf %46, %49 : vector<32x32xf32>
    %51 = math.exp %50 : vector<32x32xf32>
    %cst_19 = arith.constant dense<0.000000e+00> : vector<32xf32>
    %52 = vector.multi_reduction <add>, %51, %cst_19 [1] : vector<32x32xf32> to vector<32xf32>
    %53 = vector.shape_cast %52 : vector<32xf32> to vector<32x1xf32>
    %54 = tpu.reciprocal %53 {approx = true} : vector<32x1xf32> -> vector<32x1xf32>
    %55 = vector.broadcast %54 : vector<32x1xf32> to vector<32x32xf32>
    %56 = arith.mulf %51, %55 : vector<32x32xf32>
    %57 = arith.truncf %56 : vector<32x32xf32> to vector<32x32xbf16>
    %cst_20 = arith.constant dense<0.000000e+00> : vector<32x8xf32>
    %58 = tpu.matmul %57, %41, %cst_20 {dimension_numbers = #tpu.dot_dimension_numbers<[1], [0], [0], [1], [0, 0, 1, 1], [], []>} : vector<32x32xbf16>, vector<32x8xbf16>, vector<32x8xf32> -> vector<32x8xf32>
    %59 = vector.extract_strided_slice %35 {offsets = [0, 8], sizes = [32, 8], strides = [1, 1]} : vector<32x96xbf16> to vector<32x8xbf16>
    %60 = vector.extract_strided_slice %35 {offsets = [0, 40], sizes = [32, 8], strides = [1, 1]} : vector<32x96xbf16> to vector<32x8xbf16>
    %61 = vector.extract_strided_slice %35 {offsets = [0, 72], sizes = [32, 8], strides = [1, 1]} : vector<32x96xbf16> to vector<32x8xbf16>
    %cst_21 = arith.constant dense<0.000000e+00> : vector<32x32xf32>
    %62 = tpu.matmul %59, %60, %cst_21 {dimension_numbers = #tpu.dot_dimension_numbers<[1], [1], [0], [0], [0, 0, 1, 0], [], []>} : vector<32x8xbf16>, vector<32x8xbf16>, vector<32x32xf32> -> vector<32x32xf32>
    %cst_22 = arith.constant 0.353553385 : f32
    %63 = vector.broadcast %cst_22 : f32 to vector<32x32xf32>
    %64 = arith.mulf %62, %63 : vector<32x32xf32>
    %cst_23 = arith.constant -1.000000e+30 : f32
    %65 = vector.broadcast %cst_23 : f32 to vector<32x32xf32>
    %66 = arith.select %38, %64, %65 : vector<32x32xi1>, vector<32x32xf32>
    %cst_24 = arith.constant dense<0xFF800000> : vector<32xf32>
    %67 = vector.multi_reduction <maximumf>, %66, %cst_24 [1] : vector<32x32xf32> to vector<32xf32>
    %68 = vector.shape_cast %67 : vector<32xf32> to vector<32x1xf32>
    %69 = vector.broadcast %68 : vector<32x1xf32> to vector<32x32xf32>
    %70 = arith.subf %66, %69 : vector<32x32xf32>
    %71 = math.exp %70 : vector<32x32xf32>
    %cst_25 = arith.constant dense<0.000000e+00> : vector<32xf32>
    %72 = vector.multi_reduction <add>, %71, %cst_25 [1] : vector<32x32xf32> to vector<32xf32>
    %73 = vector.shape_cast %72 : vector<32xf32> to vector<32x1xf32>
    %74 = tpu.reciprocal %73 {approx = true} : vector<32x1xf32> -> vector<32x1xf32>
    %75 = vector.broadcast %74 : vector<32x1xf32> to vector<32x32xf32>
    %76 = arith.mulf %71, %75 : vector<32x32xf32>
    %77 = arith.truncf %76 : vector<32x32xf32> to vector<32x32xbf16>
    %cst_26 = arith.constant dense<0.000000e+00> : vector<32x8xf32>
    %78 = tpu.matmul %77, %61, %cst_26 {dimension_numbers = #tpu.dot_dimension_numbers<[1], [0], [0], [1], [0, 0, 1, 1], [], []>} : vector<32x32xbf16>, vector<32x8xbf16>, vector<32x8xf32> -> vector<32x8xf32>
    %79 = vector.extract_strided_slice %35 {offsets = [0, 16], sizes = [32, 8], strides = [1, 1]} : vector<32x96xbf16> to vector<32x8xbf16>
    %80 = vector.extract_strided_slice %35 {offsets = [0, 48], sizes = [32, 8], strides = [1, 1]} : vector<32x96xbf16> to vector<32x8xbf16>
    %81 = vector.extract_strided_slice %35 {offsets = [0, 80], sizes = [32, 8], strides = [1, 1]} : vector<32x96xbf16> to vector<32x8xbf16>
    %cst_27 = arith.constant dense<0.000000e+00> : vector<32x32xf32>
    %82 = tpu.matmul %79, %80, %cst_27 {dimension_numbers = #tpu.dot_dimension_numbers<[1], [1], [0], [0], [0, 0, 1, 0], [], []>} : vector<32x8xbf16>, vector<32x8xbf16>, vector<32x32xf32> -> vector<32x32xf32>
    %cst_28 = arith.constant 0.353553385 : f32
    %83 = vector.broadcast %cst_28 : f32 to vector<32x32xf32>
    %84 = arith.mulf %82, %83 : vector<32x32xf32>
    %cst_29 = arith.constant -1.000000e+30 : f32
    %85 = vector.broadcast %cst_29 : f32 to vector<32x32xf32>
    %86 = arith.select %38, %84, %85 : vector<32x32xi1>, vector<32x32xf32>
    %cst_30 = arith.constant dense<0xFF800000> : vector<32xf32>
    %87 = vector.multi_reduction <maximumf>, %86, %cst_30 [1] : vector<32x32xf32> to vector<32xf32>
    %88 = vector.shape_cast %87 : vector<32xf32> to vector<32x1xf32>
    %89 = vector.broadcast %88 : vector<32x1xf32> to vector<32x32xf32>
    %90 = arith.subf %86, %89 : vector<32x32xf32>
    %91 = math.exp %90 : vector<32x32xf32>
    %cst_31 = arith.constant dense<0.000000e+00> : vector<32xf32>
    %92 = vector.multi_reduction <add>, %91, %cst_31 [1] : vector<32x32xf32> to vector<32xf32>
    %93 = vector.shape_cast %92 : vector<32xf32> to vector<32x1xf32>
    %94 = tpu.reciprocal %93 {approx = true} : vector<32x1xf32> -> vector<32x1xf32>
    %95 = vector.broadcast %94 : vector<32x1xf32> to vector<32x32xf32>
    %96 = arith.mulf %91, %95 : vector<32x32xf32>
    %97 = arith.truncf %96 : vector<32x32xf32> to vector<32x32xbf16>
    %cst_32 = arith.constant dense<0.000000e+00> : vector<32x8xf32>
    %98 = tpu.matmul %97, %81, %cst_32 {dimension_numbers = #tpu.dot_dimension_numbers<[1], [0], [0], [1], [0, 0, 1, 1], [], []>} : vector<32x32xbf16>, vector<32x8xbf16>, vector<32x8xf32> -> vector<32x8xf32>
    %99 = vector.extract_strided_slice %35 {offsets = [0, 24], sizes = [32, 8], strides = [1, 1]} : vector<32x96xbf16> to vector<32x8xbf16>
    %100 = vector.extract_strided_slice %35 {offsets = [0, 56], sizes = [32, 8], strides = [1, 1]} : vector<32x96xbf16> to vector<32x8xbf16>
    %101 = vector.extract_strided_slice %35 {offsets = [0, 88], sizes = [32, 8], strides = [1, 1]} : vector<32x96xbf16> to vector<32x8xbf16>
    %cst_33 = arith.constant dense<0.000000e+00> : vector<32x32xf32>
    %102 = tpu.matmul %99, %100, %cst_33 {dimension_numbers = #tpu.dot_dimension_numbers<[1], [1], [0], [0], [0, 0, 1, 0], [], []>} : vector<32x8xbf16>, vector<32x8xbf16>, vector<32x32xf32> -> vector<32x32xf32>
    %cst_34 = arith.constant 0.353553385 : f32
    %103 = vector.broadcast %cst_34 : f32 to vector<32x32xf32>
    %104 = arith.mulf %102, %103 : vector<32x32xf32>
    %cst_35 = arith.constant -1.000000e+30 : f32
    %105 = vector.broadcast %cst_35 : f32 to vector<32x32xf32>
    %106 = arith.select %38, %104, %105 : vector<32x32xi1>, vector<32x32xf32>
    %cst_36 = arith.constant dense<0xFF800000> : vector<32xf32>
    %107 = vector.multi_reduction <maximumf>, %106, %cst_36 [1] : vector<32x32xf32> to vector<32xf32>
    %108 = vector.shape_cast %107 : vector<32xf32> to vector<32x1xf32>
    %109 = vector.broadcast %108 : vector<32x1xf32> to vector<32x32xf32>
    %110 = arith.subf %106, %109 : vector<32x32xf32>
    %111 = math.exp %110 : vector<32x32xf32>
    %cst_37 = arith.constant dense<0.000000e+00> : vector<32xf32>
    %112 = vector.multi_reduction <add>, %111, %cst_37 [1] : vector<32x32xf32> to vector<32xf32>
    %113 = vector.shape_cast %112 : vector<32xf32> to vector<32x1xf32>
    %114 = tpu.reciprocal %113 {approx = true} : vector<32x1xf32> -> vector<32x1xf32>
    %115 = vector.broadcast %114 : vector<32x1xf32> to vector<32x32xf32>
    %116 = arith.mulf %111, %115 : vector<32x32xf32>
    %117 = arith.truncf %116 : vector<32x32xf32> to vector<32x32xbf16>
    %cst_38 = arith.constant dense<0.000000e+00> : vector<32x8xf32>
    %118 = tpu.matmul %117, %101, %cst_38 {dimension_numbers = #tpu.dot_dimension_numbers<[1], [0], [0], [1], [0, 0, 1, 1], [], []>} : vector<32x32xbf16>, vector<32x8xbf16>, vector<32x8xf32> -> vector<32x8xf32>
    %119 = tpu.concatenate %58, %78, %98, %118 in 1 : vector<32x8xf32>, vector<32x8xf32>, vector<32x8xf32>, vector<32x8xf32> -> vector<32x32xf32>
    %120 = arith.truncf %119 : vector<32x32xf32> to vector<32x32xbf16>
    %c800 = arith.constant 800 : index
    %c0_39 = arith.constant 0 : index
    %121 = vector.load %arg1[%c800, %c0_39] : memref<1056x128xbf16, #tpu.memory_space<vmem>>, vector<32x32xbf16>
    %cst_40 = arith.constant dense<0.000000e+00> : vector<32x32xf32>
    %122 = tpu.matmul %120, %121, %cst_40 {dimension_numbers = #tpu.dot_dimension_numbers<[1], [0], [0], [1], [0, 0, 1, 1], [], []>} : vector<32x32xbf16>, vector<32x32xbf16>, vector<32x32xf32> -> vector<32x32xf32>
    %123 = arith.addf %4, %122 : vector<32x32xf32>
    %c2 = arith.constant 2 : index
    %c0_41 = arith.constant 0 : index
    %124 = vector.load %arg2[%c2, %c0_41] : memref<88x128xf32, #tpu.memory_space<vmem>>, vector<1x32xf32>
    %125 = vector.broadcast %124 : vector<1x32xf32> to vector<32x32xf32>
    %126 = arith.addf %123, %125 : vector<32x32xf32>
    %c3 = arith.constant 3 : index
    %c0_42 = arith.constant 0 : index
    %127 = vector.load %arg2[%c3, %c0_42] : memref<88x128xf32, #tpu.memory_space<vmem>>, vector<1x32xf32>
    %c4 = arith.constant 4 : index
    %c0_43 = arith.constant 0 : index
    %128 = vector.load %arg2[%c4, %c0_43] : memref<88x128xf32, #tpu.memory_space<vmem>>, vector<1x32xf32>
    %cst_44 = arith.constant dense<0.000000e+00> : vector<32xf32>
    %129 = vector.multi_reduction <add>, %126, %cst_44 [1] : vector<32x32xf32> to vector<32xf32>
    %130 = vector.shape_cast %129 : vector<32xf32> to vector<32x1xf32>
    %cst_45 = arith.constant 3.200000e+01 : f32
    %131 = vector.broadcast %cst_45 : f32 to vector<32x1xf32>
    %132 = arith.divf %130, %131 : vector<32x1xf32>
    %133 = vector.broadcast %132 : vector<32x1xf32> to vector<32x32xf32>
    %134 = arith.subf %126, %133 : vector<32x32xf32>
    %135 = arith.mulf %134, %134 : vector<32x32xf32>
    %cst_46 = arith.constant dense<0.000000e+00> : vector<32xf32>
    %136 = vector.multi_reduction <add>, %135, %cst_46 [1] : vector<32x32xf32> to vector<32xf32>
    %137 = vector.shape_cast %136 : vector<32xf32> to vector<32x1xf32>
    %cst_47 = arith.constant 3.200000e+01 : f32
    %138 = vector.broadcast %cst_47 : f32 to vector<32x1xf32>
    %139 = arith.divf %137, %138 : vector<32x1xf32>
    %140 = vector.broadcast %132 : vector<32x1xf32> to vector<32x32xf32>
    %141 = arith.subf %126, %140 : vector<32x32xf32>
    %cst_48 = arith.constant 9.99999974E-6 : f32
    %142 = vector.broadcast %cst_48 : f32 to vector<32x1xf32>
    %143 = arith.addf %139, %142 : vector<32x1xf32>
    %144 = math.rsqrt %143 : vector<32x1xf32>
    %145 = vector.broadcast %144 : vector<32x1xf32> to vector<32x32xf32>
    %146 = arith.mulf %141, %145 : vector<32x32xf32>
    %147 = vector.broadcast %127 : vector<1x32xf32> to vector<32x32xf32>
    %148 = arith.mulf %146, %147 : vector<32x32xf32>
    %149 = vector.broadcast %128 : vector<1x32xf32> to vector<32x32xf32>
    %150 = arith.addf %148, %149 : vector<32x32xf32>
    %151 = arith.truncf %150 : vector<32x32xf32> to vector<32x32xbf16>
    %c832 = arith.constant 832 : index
    %c0_49 = arith.constant 0 : index
    %152 = vector.load %arg1[%c832, %c0_49] : memref<1056x128xbf16, #tpu.memory_space<vmem>>, vector<32x128xbf16>
    %cst_50 = arith.constant dense<0.000000e+00> : vector<32x128xf32>
    %153 = tpu.matmul %151, %152, %cst_50 {dimension_numbers = #tpu.dot_dimension_numbers<[1], [0], [0], [1], [0, 0, 1, 1], [], []>} : vector<32x32xbf16>, vector<32x128xbf16>, vector<32x128xf32> -> vector<32x128xf32>
    %c17 = arith.constant 17 : index
    %c0_51 = arith.constant 0 : index
    %154 = vector.load %arg2[%c17, %c0_51] : memref<88x128xf32, #tpu.memory_space<vmem>>, vector<1x128xf32>
    %155 = vector.broadcast %154 : vector<1x128xf32> to vector<32x128xf32>
    %156 = arith.addf %153, %155 : vector<32x128xf32>
    %157 = arith.mulf %156, %156 : vector<32x128xf32>
    %158 = arith.mulf %156, %157 : vector<32x128xf32>
    %cst_52 = arith.constant 4.471500e-02 : f32
    %159 = vector.broadcast %cst_52 : f32 to vector<32x128xf32>
    %160 = arith.mulf %159, %158 : vector<32x128xf32>
    %161 = arith.addf %156, %160 : vector<32x128xf32>
    %cst_53 = arith.constant 0.797884583 : f32
    %162 = vector.broadcast %cst_53 : f32 to vector<32x128xf32>
    %163 = arith.mulf %162, %161 : vector<32x128xf32>
    %164 = math.tanh %163 : vector<32x128xf32>
    %cst_54 = arith.constant 1.000000e+00 : f32
    %165 = vector.broadcast %cst_54 : f32 to vector<32x128xf32>
    %166 = arith.addf %165, %164 : vector<32x128xf32>
    %cst_55 = arith.constant 5.000000e-01 : f32
    %167 = vector.broadcast %cst_55 : f32 to vector<32x128xf32>
    %168 = arith.mulf %167, %166 : vector<32x128xf32>
    %169 = arith.mulf %156, %168 : vector<32x128xf32>
    %170 = arith.truncf %169 : vector<32x128xf32> to vector<32x128xbf16>
    %c864 = arith.constant 864 : index
    %c0_56 = arith.constant 0 : index
    %171 = vector.load %arg1[%c864, %c0_56] : memref<1056x128xbf16, #tpu.memory_space<vmem>>, vector<128x32xbf16>
    %cst_57 = arith.constant dense<0.000000e+00> : vector<32x32xf32>
    %172 = tpu.matmul %170, %171, %cst_57 {dimension_numbers = #tpu.dot_dimension_numbers<[1], [0], [0], [1], [0, 0, 1, 1], [], []>} : vector<32x128xbf16>, vector<128x32xbf16>, vector<32x32xf32> -> vector<32x32xf32>
    %173 = arith.addf %126, %172 : vector<32x32xf32>
    %c5 = arith.constant 5 : index
    %c0_58 = arith.constant 0 : index
    %174 = vector.load %arg2[%c5, %c0_58] : memref<88x128xf32, #tpu.memory_space<vmem>>, vector<1x32xf32>
    %175 = vector.broadcast %174 : vector<1x32xf32> to vector<32x32xf32>
    %176 = arith.addf %173, %175 : vector<32x32xf32>
    %c6 = arith.constant 6 : index
    %c0_59 = arith.constant 0 : index
    %177 = vector.load %arg2[%c6, %c0_59] : memref<88x128xf32, #tpu.memory_space<vmem>>, vector<1x32xf32>
    %c7 = arith.constant 7 : index
    %c0_60 = arith.constant 0 : index
    %178 = vector.load %arg2[%c7, %c0_60] : memref<88x128xf32, #tpu.memory_space<vmem>>, vector<1x32xf32>
    %cst_61 = arith.constant dense<0.000000e+00> : vector<32xf32>
    %179 = vector.multi_reduction <add>, %176, %cst_61 [1] : vector<32x32xf32> to vector<32xf32>
    %180 = vector.shape_cast %179 : vector<32xf32> to vector<32x1xf32>
    %cst_62 = arith.constant 3.200000e+01 : f32
    %181 = vector.broadcast %cst_62 : f32 to vector<32x1xf32>
    %182 = arith.divf %180, %181 : vector<32x1xf32>
    %183 = vector.broadcast %182 : vector<32x1xf32> to vector<32x32xf32>
    %184 = arith.subf %176, %183 : vector<32x32xf32>
    %185 = arith.mulf %184, %184 : vector<32x32xf32>
    %cst_63 = arith.constant dense<0.000000e+00> : vector<32xf32>
    %186 = vector.multi_reduction <add>, %185, %cst_63 [1] : vector<32x32xf32> to vector<32xf32>
    %187 = vector.shape_cast %186 : vector<32xf32> to vector<32x1xf32>
    %cst_64 = arith.constant 3.200000e+01 : f32
    %188 = vector.broadcast %cst_64 : f32 to vector<32x1xf32>
    %189 = arith.divf %187, %188 : vector<32x1xf32>
    %190 = vector.broadcast %182 : vector<32x1xf32> to vector<32x32xf32>
    %191 = arith.subf %176, %190 : vector<32x32xf32>
    %cst_65 = arith.constant 9.99999974E-6 : f32
    %192 = vector.broadcast %cst_65 : f32 to vector<32x1xf32>
    %193 = arith.addf %189, %192 : vector<32x1xf32>
    %194 = math.rsqrt %193 : vector<32x1xf32>
    %195 = vector.broadcast %194 : vector<32x1xf32> to vector<32x32xf32>
    %196 = arith.mulf %191, %195 : vector<32x32xf32>
    %197 = vector.broadcast %177 : vector<1x32xf32> to vector<32x32xf32>
    %198 = arith.mulf %196, %197 : vector<32x32xf32>
    %199 = vector.broadcast %178 : vector<1x32xf32> to vector<32x32xf32>
    %200 = arith.addf %198, %199 : vector<32x32xf32>
    %201 = vector.extract_strided_slice %200 {offsets = [0, 0], sizes = [1, 32], strides = [1, 1]} : vector<32x32xf32> to vector<1x32xf32>
    %202 = vector.broadcast %201 : vector<1x32xf32> to vector<32x32xf32>
    %203 = arith.mulf %200, %202 : vector<32x32xf32>
    %c8 = arith.constant 8 : index
    %c0_66 = arith.constant 0 : index
    %204 = vector.load %arg2[%c8, %c0_66] : memref<88x128xf32, #tpu.memory_space<vmem>>, vector<1x32xf32>
    %c9 = arith.constant 9 : index
    %c0_67 = arith.constant 0 : index
    %205 = vector.load %arg2[%c9, %c0_67] : memref<88x128xf32, #tpu.memory_space<vmem>>, vector<1x32xf32>
    %cst_68 = arith.constant dense<0.000000e+00> : vector<32xf32>
    %206 = vector.multi_reduction <add>, %203, %cst_68 [1] : vector<32x32xf32> to vector<32xf32>
    %207 = vector.shape_cast %206 : vector<32xf32> to vector<32x1xf32>
    %cst_69 = arith.constant 3.200000e+01 : f32
    %208 = vector.broadcast %cst_69 : f32 to vector<32x1xf32>
    %209 = arith.divf %207, %208 : vector<32x1xf32>
    %210 = vector.broadcast %209 : vector<32x1xf32> to vector<32x32xf32>
    %211 = arith.subf %203, %210 : vector<32x32xf32>
    %212 = arith.mulf %211, %211 : vector<32x32xf32>
    %cst_70 = arith.constant dense<0.000000e+00> : vector<32xf32>
    %213 = vector.multi_reduction <add>, %212, %cst_70 [1] : vector<32x32xf32> to vector<32xf32>
    %214 = vector.shape_cast %213 : vector<32xf32> to vector<32x1xf32>
    %cst_71 = arith.constant 3.200000e+01 : f32
    %215 = vector.broadcast %cst_71 : f32 to vector<32x1xf32>
    %216 = arith.divf %214, %215 : vector<32x1xf32>
    %217 = vector.broadcast %209 : vector<32x1xf32> to vector<32x32xf32>
    %218 = arith.subf %203, %217 : vector<32x32xf32>
    %cst_72 = arith.constant 9.99999974E-6 : f32
    %219 = vector.broadcast %cst_72 : f32 to vector<32x1xf32>
    %220 = arith.addf %216, %219 : vector<32x1xf32>
    %221 = math.rsqrt %220 : vector<32x1xf32>
    %222 = vector.broadcast %221 : vector<32x1xf32> to vector<32x32xf32>
    %223 = arith.mulf %218, %222 : vector<32x32xf32>
    %224 = vector.broadcast %204 : vector<1x32xf32> to vector<32x32xf32>
    %225 = arith.mulf %223, %224 : vector<32x32xf32>
    %226 = vector.broadcast %205 : vector<1x32xf32> to vector<32x32xf32>
    %227 = arith.addf %225, %226 : vector<32x32xf32>
    %c0_73 = arith.constant 0 : index
    %c0_74 = arith.constant 0 : index
    %228 = vector.load %arg3[%c0_73, %c0_74] : memref<8x128xf32, #tpu.memory_space<vmem>>, vector<1x32xf32>
    %229 = arith.truncf %228 : vector<1x32xf32> to vector<1x32xbf16>
    %c1024 = arith.constant 1024 : index
    %c0_75 = arith.constant 0 : index
    %230 = vector.load %arg1[%c1024, %c0_75] : memref<1056x128xbf16, #tpu.memory_space<vmem>>, vector<32x32xbf16>
    %cst_76 = arith.constant dense<0.000000e+00> : vector<1x32xf32>
    %231 = tpu.matmul %229, %230, %cst_76 {dimension_numbers = #tpu.dot_dimension_numbers<[1], [0], [0], [1], [0, 0, 1, 1], [], []>} : vector<1x32xbf16>, vector<32x32xbf16>, vector<1x32xf32> -> vector<1x32xf32>
    %c10 = arith.constant 10 : index
    %c0_77 = arith.constant 0 : index
    %232 = vector.load %arg2[%c10, %c0_77] : memref<88x128xf32, #tpu.memory_space<vmem>>, vector<1x32xf32>
    %233 = arith.addf %231, %232 : vector<1x32xf32>
    %234 = arith.truncf %227 : vector<32x32xf32> to vector<32x32xbf16>
    %c992 = arith.constant 992 : index
    %c0_78 = arith.constant 0 : index
    %235 = vector.load %arg1[%c992, %c0_78] : memref<1056x128xbf16, #tpu.memory_space<vmem>>, vector<32x32xbf16>
    %cst_79 = arith.constant dense<0.000000e+00> : vector<32x32xf32>
    %236 = tpu.matmul %234, %235, %cst_79 {dimension_numbers = #tpu.dot_dimension_numbers<[1], [0], [0], [1], [0, 0, 1, 1], [], []>} : vector<32x32xbf16>, vector<32x32xbf16>, vector<32x32xf32> -> vector<32x32xf32>
    %c11 = arith.constant 11 : index
    %c0_80 = arith.constant 0 : index
    %237 = vector.load %arg2[%c11, %c0_80] : memref<88x128xf32, #tpu.memory_space<vmem>>, vector<1x32xf32>
    %238 = vector.broadcast %237 : vector<1x32xf32> to vector<32x32xf32>
    %239 = arith.addf %236, %238 : vector<32x32xf32>
    %c12 = arith.constant 12 : index
    %c0_81 = arith.constant 0 : index
    %240 = vector.load %arg2[%c12, %c0_81] : memref<88x128xf32, #tpu.memory_space<vmem>>, vector<1x32xf32>
    %241 = vector.broadcast %240 : vector<1x32xf32> to vector<32x32xf32>
    %242 = arith.mulf %227, %241 : vector<32x32xf32>
    %cst_82 = arith.constant dense<0.000000e+00> : vector<32xf32>
    %243 = vector.multi_reduction <add>, %242, %cst_82 [1] : vector<32x32xf32> to vector<32xf32>
    %244 = vector.shape_cast %243 : vector<32xf32> to vector<32x1xf32>
    %c14 = arith.constant 14 : index
    %c0_83 = arith.constant 0 : index
    %245 = vector.load %arg2[%c14, %c0_83] : memref<88x128xf32, #tpu.memory_space<vmem>>, vector<1x1xf32>
    %246 = vector.broadcast %245 : vector<1x1xf32> to vector<32x1xf32>
    %247 = arith.addf %244, %246 : vector<32x1xf32>
    %c13 = arith.constant 13 : index
    %c0_84 = arith.constant 0 : index
    %248 = vector.load %arg2[%c13, %c0_84] : memref<88x128xf32, #tpu.memory_space<vmem>>, vector<1x32xf32>
    %249 = vector.broadcast %248 : vector<1x32xf32> to vector<32x32xf32>
    %250 = arith.mulf %227, %249 : vector<32x32xf32>
    %cst_85 = arith.constant dense<0.000000e+00> : vector<32xf32>
    %251 = vector.multi_reduction <add>, %250, %cst_85 [1] : vector<32x32xf32> to vector<32xf32>
    %252 = vector.shape_cast %251 : vector<32xf32> to vector<32x1xf32>
    %c15 = arith.constant 15 : index
    %c0_86 = arith.constant 0 : index
    %253 = vector.load %arg2[%c15, %c0_86] : memref<88x128xf32, #tpu.memory_space<vmem>>, vector<1x1xf32>
    %254 = vector.broadcast %253 : vector<1x1xf32> to vector<32x1xf32>
    %255 = arith.addf %252, %254 : vector<32x1xf32>
    %cst_87 = arith.constant 0.000000e+00 : f32
    %256 = vector.broadcast %cst_87 : f32 to vector<32x1xf32>
    %257 = arith.cmpf ogt, %255, %256 : vector<32x1xf32>
    %cst_88 = arith.constant 1.000000e+00 : f32
    %258 = vector.broadcast %cst_88 : f32 to vector<32x1xf32>
    %259 = arith.addf %255, %258 : vector<32x1xf32>
    %260 = math.exp %255 : vector<32x1xf32>
    %261 = arith.select %257, %259, %260 : vector<32x1xi1>, vector<32x1xf32>
    %262 = arith.mulf %239, %239 : vector<32x32xf32>
    %cst_89 = arith.constant dense<0.000000e+00> : vector<32xf32>
    %263 = vector.multi_reduction <add>, %262, %cst_89 [1] : vector<32x32xf32> to vector<32xf32>
    %264 = vector.shape_cast %263 : vector<32xf32> to vector<32x1xf32>
    %cst_90 = arith.constant 9.99999997E-7 : f32
    %265 = vector.broadcast %cst_90 : f32 to vector<32x1xf32>
    %266 = arith.addf %264, %265 : vector<32x1xf32>
    %267 = math.rsqrt %266 : vector<32x1xf32>
    %268 = vector.broadcast %267 : vector<32x1xf32> to vector<32x32xf32>
    %269 = arith.mulf %239, %268 : vector<32x32xf32>
    %270 = arith.mulf %233, %233 : vector<1x32xf32>
    %cst_91 = arith.constant dense<0.000000e+00> : vector<1xf32>
    %271 = vector.multi_reduction <add>, %270, %cst_91 [1] : vector<1x32xf32> to vector<1xf32>
    %272 = vector.shape_cast %271 : vector<1xf32> to vector<1x1xf32>
    %cst_92 = arith.constant 9.99999997E-7 : f32
    %273 = vector.broadcast %cst_92 : f32 to vector<1x1xf32>
    %274 = arith.addf %272, %273 : vector<1x1xf32>
    %275 = math.rsqrt %274 : vector<1x1xf32>
    %276 = vector.broadcast %275 : vector<1x1xf32> to vector<1x32xf32>
    %277 = arith.mulf %233, %276 : vector<1x32xf32>
    %278 = vector.broadcast %277 : vector<1x32xf32> to vector<32x32xf32>
    %279 = arith.mulf %269, %278 : vector<32x32xf32>
    %cst_93 = arith.constant dense<0.000000e+00> : vector<32xf32>
    %280 = vector.multi_reduction <add>, %279, %cst_93 [1] : vector<32x32xf32> to vector<32xf32>
    %281 = vector.shape_cast %280 : vector<32xf32> to vector<32x1xf32>
    %282 = arith.addf %281, %247 : vector<32x1xf32>
    %283 = arith.mulf %282, %261 : vector<32x1xf32>
    %c56 = arith.constant 56 : index
    %c0_94 = arith.constant 0 : index
    %284 = vector.load %arg2[%c56, %c0_94] : memref<88x128xf32, #tpu.memory_space<vmem>>, vector<32x128xf32>
    %285 = vector.broadcast %283 : vector<32x1xf32> to vector<32x128xf32>
    %286 = arith.mulf %285, %284 : vector<32x128xf32>
    %cst_95 = arith.constant dense<0.000000e+00> : vector<128xf32>
    %287 = vector.multi_reduction <add>, %286, %cst_95 [0] : vector<32x128xf32> to vector<128xf32>
    %288 = vector.shape_cast %287 : vector<128xf32> to vector<1x128xf32>
    %c18 = arith.constant 18 : index
    %c0_96 = arith.constant 0 : index
    %289 = vector.load %arg2[%c18, %c0_96] : memref<88x128xf32, #tpu.memory_space<vmem>>, vector<1x128xf32>
    %290 = arith.addf %288, %289 : vector<1x128xf32>
    %291 = vector.shape_cast %290 : vector<1x128xf32> to vector<1x128xf32>
    %292 = vector.broadcast %291 : vector<1x128xf32> to vector<8x128xf32>
    %c0_97 = arith.constant 0 : index
    %c0_98 = arith.constant 0 : index
    %293 = vector.load %arg4[%c0_97, %c0_98] : memref<8x128xf32, #tpu.memory_space<vmem>>, vector<8x128xf32>
    tpu.vector_store %arg4[%c0_97, %c0_98], %292 {strides = array<i32>} : memref<8x128xf32, #tpu.memory_space<vmem>>, vector<8x128xf32>,
    return
  }
}

</mosaic_0001>

<bundles_post_ra>
// kernel: forward.1
= control target key start
LH: loop header
LB: loop body
LE: loop exit
PB: predicated region body
PF: predicated region fallthrough
CT: control target
= control target key end

     0   :  { %vm627_vm0 = vcmask 261120   ;;  %vm786_vm1 = vcmask 64512   ;;  %s3107_s22 = smov 88   ;;  %s3108_s23 = smov 96   ;;  %vm1567_vm3 = vcmask 130048   ;;  %vm1572_vm4 = vcmask 195584   ;;  %s3832_s1 = inlined_call_operand.vmem [shape: bf16[1056,128], index: 1, kind: input, shape index: {}]   ;;  %s3833_s0 = inlined_call_operand.vmem [shape: bf16[32,768], index: 0, kind: input, shape index: {}]   ;;  %s3834_s2 = inlined_call_operand.vmem [shape: f32[88,128], index: 2, kind: input, shape index: {}]   ;;  %s3835_s3 = inlined_call_operand.vmem [shape: f32[8,128], index: 3, kind: input, shape index: {}]   ;;  %s3836_s4 = inlined_call_operand.vmem [shape: f32[8,128], index: 4, kind: output, shape index: {}]  }
   0x1   :  { %v2901_v0 = vld [vmem:[%s3832_s1 + $0x78] sm:$0xff]   ;;  %v2905_v4 = vld [vmem:[%s3832_s1 + $0x70] sm:$0xff]   ;;  %v2909_v8 = vld [vmem:[%s3832_s1 + $0x68] sm:$0xff]   ;;  %s3109_s24 = smov 120   ;;  %s3110_s25 = smov 112   ;;  %vm3122_vm5 = vmmov 0  }
   0x2   :  { %v2902_v1 = vld [vmem:[%s3832_s1 + $0x38] sm:$0xff]   ;;  %2575 = vmatprep.subr.bf16.mxu0 %v2901_v0  ;;  %v2906_v5 = vld [vmem:[%s3832_s1 + $0x30] sm:$0xff]   ;;  %v2910_v9 = vld [vmem:[%s3832_s1 + $0x28] sm:$0xff]   ;;  %s3111_s26 = smov 80   ;;  %s3112_s27 = smov 64   ;;  %vm2372_vm6 = vcmask 253952  }
   0x3   :  { %v2903_v2 = vld [vmem:[%s3832_s1 + $0xf8] sm:$0xff]   ;;  %2576 = vmatpush3.bf16.msra.mxu0 %v2902_v1  ;;  %v2907_v6 = vld [vmem:[%s3832_s1 + $0xf0] sm:$0xff]   ;;  %v2911_v10 = vld [vmem:[%s3832_s1 + $0xe8] sm:$0xff]   ;;  %s3113_s28 = smov 56   ;;  %s3114_s29 = smov 48  }
   0x4   :  { %v2904_v3 = vld [vmem:[%s3832_s1 + $0xb8] sm:$0xff]   ;;  %2603 = vmatprep.subr.bf16.mxu1 %v2903_v2  ;;  %2577 = vmatprep.subr.bf16.mxu0 %v2905_v4  ;;  %v2908_v7 = vld [vmem:[%s3832_s1 + $0xb0] sm:$0xff]   ;;  %v2912_v11 = vld [vmem:[%s3832_s1 + $0xa8] sm:$0xff]   ;;  %s3115_s30 = smov 72   ;;  %s3116_s5 = smov 104  }
   0x5   :  { %2604 = vmatpush3.bf16.msra.mxu1 %v2904_v3  ;;  %v2913_v12 = vld [vmem:[%s3832_s1 + $0x60] sm:$0xff]   ;;  %v2917_v16 = vld [vmem:[%s3832_s1 + $0x58] sm:$0xff]   ;;  %v2921_v20 = vld [vmem:[%s3832_s1 + $0x50] sm:$0xff]   ;;  %s3117_s6 = smov 40   ;;  %s3119_s7 = smov 16  }
   0x6   :  { %2605 = vmatprep.subr.bf16.mxu1 %v2907_v6  ;;  %v2914_v13 = vld [vmem:[%s3832_s1 + $0x20] sm:$0xff]   ;;  %v2918_v17 = vld [vmem:[%s3832_s1 + $0x18] sm:$0xff]   ;;  %v2922_v21 = vld [vmem:[%s3832_s1 + $0x10] sm:$0xff]   ;;  %s3120_s12 = smov 24  }
   0x7   :  { %2578 = vmatpush3.bf16.msra.mxu0 %v2906_v5  ;;  %v2915_v14 = vld [vmem:[%s3832_s1 + $0xe0] sm:$0xff]   ;;  %v2919_v18 = vld [vmem:[%s3832_s1 + $0xd8] sm:$0xff]   ;;  %v2923_v22 = vld [vmem:[%s3832_s1 + $0xd0] sm:$0xff]  }
   0x8   :  { %2579 = vmatprep.subr.bf16.mxu0 %v2909_v8  ;;  %v2916_v15 = vld [vmem:[%s3832_s1 + $0xa0] sm:$0xff]   ;;  %v2920_v19 = vld [vmem:[%s3832_s1 + $0x98] sm:$0xff]   ;;  %v2924_v23 = vld [vmem:[%s3832_s1 + $0x90] sm:$0xff]  }
   0x9   :  { %2606 = vmatpush3.bf16.msra.mxu1 %v2908_v7  ;;  %v2925_v24 = vld [vmem:[%s3832_s1 + $0x48] sm:$0xff]   ;;  %v2929_v28 = vld [vmem:[%s3832_s1 + $0x40] sm:$0xff]   ;;  %v2936_v34 = vld [vmem:[%s3832_s1 + $0x178] sm:$0xff]  }
   0xa   :  { %2607 = vmatprep.subr.bf16.mxu1 %v2911_v10  ;;  %v2926_v25 = vld [vmem:[%s3832_s1 + $0x8] sm:$0xff]   ;;  %v2930_v29 = vld [vmem:[%s3832_s1] sm:$0xff]   ;;  %v2940_v37 = vld [vmem:[%s3832_s1 + $0x138] sm:$0xff]  }
   0xb   :  { %2580 = vmatpush3.bf16.msra.mxu0 %v2910_v9  ;;  %v2927_v26 = vld [vmem:[%s3832_s1 + $0xc8] sm:$0xff]   ;;  %v2931_v30 = vld [vmem:[%s3832_s1 + $0xc0] sm:$0xff]   ;;  %v2941_v38 = vld [vmem:[%s3832_s1 + $0x170] sm:$0xff]  }
   0xc   :  { %2581 = vmatprep.subr.bf16.mxu0 %v2913_v12  ;;  %v2928_v27 = vld [vmem:[%s3832_s1 + $0x88] sm:$0xff]   ;;  %v2932_v31 = vld [vmem:[%s3833_s0] ss:$24 sps:$4 sm:$0xff]   ;;  %v2934_v32 = vld [vmem:[%s3833_s0 + $0x4] ss:$24 sps:$4 sm:$0xff]  }
   0xd   :  { %2608 = vmatpush3.bf16.msra.mxu1 %v2912_v11  ;;  %v2935_v33 = vld [vmem:[%s3832_s1 + $0x80] sm:$0xff]   ;;  %510 = vmatprep.mubr.bf16.mxu0 %v2934_v32  ;;  %v2942_v39 = vld [vmem:[%s3832_s1 + $0x130] sm:$0xff]   ;;  %v2943_v40 = vld [vmem:[%s3832_s1 + $0x168] sm:$0xff]  }
   0xe   :  { %2609 = vmatprep.subr.bf16.mxu1 %v2915_v14  ;;  %v2937_v35 = vld [vmem:[%s3833_s0 + $0x8] ss:$24 sps:$4 sm:$0xff]   ;;  %v2939_v36 = vld [vmem:[%s3833_s0 + $0xc] ss:$24 sps:$4 sm:$0xff]   ;;  %v2947_v45 = vld [vmem:[%s3832_s1 + $0x158] sm:$0xff]  }
   0xf   :  { %2582 = vmatpush3.bf16.msra.mxu0 %v2914_v13  ;;  %559 = vmatprep.mubr.bf16.mxu1 %v2939_v36  ;;  %v2944_v41 = vld [vmem:[%s3832_s1 + $0x128] sm:$0xff]   ;;  %v2945_v42 = vld [vmem:[%s3832_s1 + $0x160] sm:$0xff]   ;;  %v2952_v47 = vld [vmem:[%s3833_s0 + $0x3c] ss:$24 sps:$4 sm:$0xff]  }
  0x10   :  { %2583 = vmatprep.subr.bf16.mxu0 %v2917_v16  ;;  %v2946_v43 = vld [vmem:[%s3832_s1 + $0x120] sm:$0xff]   ;;  %v2948_v44 = vld [vmem:[%s3833_s0 + $0x34] ss:$24 sps:$4 sm:$0xff]   ;;  %v2951_v46 = vld [vmem:[%s3833_s0 + $0x30] ss:$24 sps:$4 sm:$0xff]  }
  0x11   :  { %2610 = vmatpush3.bf16.msra.mxu1 %v2916_v15  ;;  %v2954_v48 = vld [vmem:[%s3833_s0 + $0x38] ss:$24 sps:$4 sm:$0xff]   ;;  %v2963_v52 = vld [vmem:[%s3833_s0 + $0x14] ss:$24 sps:$4 sm:$0xff]   ;;  %v2959_v55 = vld [vmem:[%s3832_s1 + $0x140] sm:$0xff]  }
  0x12   :  { %2611 = vmatprep.subr.bf16.mxu1 %v2919_v18  ;;  %v2950_v49 = vld [vmem:[%s3832_s1 + $0x118] sm:$0xff]   ;;  %v2955_v50 = vld [vmem:[%s3832_s1 + $0x150] sm:$0xff]   ;;  %v2957_v53 = vld [vmem:[%s3832_s1 + $0x148] sm:$0xff]  }
  0x13   :  { %2584 = vmatpush3.bf16.msra.mxu0 %v2918_v17  ;;  %v2956_v51 = vld [vmem:[%s3832_s1 + $0x110] sm:$0xff]   ;;  %v2958_v54 = vld [vmem:[%s3832_s1 + $0x108] sm:$0xff]   ;;  %v2960_v56 = vld [vmem:[%s3832_s1 + $0x100] sm:$0xff]  }
  0x14   :  { %2585 = vmatprep.subr.bf16.mxu0 %v2921_v20  ;;  %v2961_v57 = vld [vmem:[%s3833_s0 + $0x10] ss:$24 sps:$4 sm:$0xff]   ;;  %v2964_v58 = vld [vmem:[%s3833_s0 + $0x44] ss:$24 sps:$4 sm:$0xff]   ;;  %v2966_v59 = vld [vmem:[%s3833_s0 + $0x40] ss:$24 sps:$4 sm:$0xff]  }
  0x15   :  { %2612 = vmatpush3.bf16.msra.mxu1 %v2920_v19  ;;  %v126_v8 = vld [vmem:[%s3834_s2 + $0x18] sm:$0xff]  ;;  %v127_v14 = vld [vmem:[%s3834_s2 + $0x20] sm:$0xff]  ;;  %s3118_s0 = smov 8  }
  0x16   :  { %2613 = vmatprep.subr.bf16.mxu1 %v2923_v22  ;;  %v128_v22 = vld [vmem:[%s3834_s2 + $0x28] sm:$0xff] }
  0x17   :  { %2586 = vmatpush3.bf16.msra.mxu0 %v2922_v21 }
  0x18   :  { %2587 = vmatprep.subr.bf16.mxu0 %v2925_v24 }
  0x19   :  { %2614 = vmatpush3.bf16.msra.mxu1 %v2924_v23 }
  0x1a   :  { %2615 = vmatprep.subr.bf16.mxu1 %v2927_v26 }
  0x1b   :  { %2588 = vmatpush3.bf16.msra.mxu0 %v2926_v25 }
  0x1c   :  { %2589 = vmatprep.subr.bf16.mxu0 %v2929_v28 }
  0x1d   :  { %2616 = vmatpush3.bf16.msra.mxu1 %v2928_v27 }
  0x1e   :  { %2617 = vmatprep.subr.bf16.mxu1 %v2931_v30 }
  0x1f   :  { %2590 = vmatpush3.bf16.msra.mxu0 %v2930_v29 }
  0x20   :  { %2631 = vmatprep.subr.bf16.mxu0 %v2936_v34  ;;  %v129_v34 = vld [vmem:[%s3834_s2 + $0x30] sm:$0xff] }
  0x21   :  { %2618 = vmatpush3.bf16.msra.mxu1 %v2935_v33 }
  0x22   :  { %511 = vmatmul.mubr.bf16.vlgmr.msra.gmra.mxu0 %v2932_v31 }
  0x23   :  { %2632 = vmatpush3.bf16.msra.mxu0 %v2940_v37  ;;  %518 = vmatprep.mubr.bf16.mxu0 %v2948_v44 }
  0x24   :  { %560 = vmatmul.mubr.bf16.vlgmr.msra.gmra.mxu1 %v2937_v35  ;;  %2633 = vmatprep.subr.bf16.mxu0 %v2941_v38 }
  0x25   :  { %567 = vmatprep.mubr.bf16.mxu1 %v2952_v47 }
  0x27   :  { %2634 = vmatpush3.bf16.msra.mxu0 %v2942_v39 }
  0x28   :  { %2635 = vmatprep.subr.bf16.mxu0 %v2943_v40 }
  0x2a   :  { %519 = vmatmul.mubr.bf16.gmra.mxu0 %v2951_v46 }
  0x2b   :  { %2636 = vmatpush3.bf16.msra.mxu0 %v2944_v41  ;;  %608 = vmatprep.mubr.bf16.mxu0 %v2963_v52 }
  0x2c   :  { %2637 = vmatprep.subr.bf16.mxu0 %v2945_v42  ;;  %568 = vmatmul.mubr.bf16.gmra.mxu1 %v2954_v48 }
  0x2f   :  { %2638 = vmatpush3.bf16.msra.mxu0 %v2946_v43 }
  0x30   :  { %2639 = vmatprep.subr.bf16.mxu0 %v2947_v45 }
  0x33   :  { %2640 = vmatpush3.bf16.msra.mxu0 %v2950_v49 }
  0x34   :  { %2641 = vmatprep.subr.bf16.mxu0 %v2955_v50 }
  0x37   :  { %2642 = vmatpush3.bf16.msra.mxu0 %v2956_v51 }
  0x38   :  { %2643 = vmatprep.subr.bf16.mxu0 %v2957_v53 }
  0x3b   :  { %2644 = vmatpush3.bf16.msra.mxu0 %v2958_v54 }
  0x3c   :  { %2645 = vmatprep.subr.bf16.mxu0 %v2959_v55 }
  0x3f   :  { %2646 = vmatpush3.bf16.msra.mxu0 %v2960_v56 }
  0x42   :  { %609 = vmatmul.mubr.bf16.vlgmr.msra.gmra.mxu0 %v2961_v57 }
  0x43   :  { %616 = vmatprep.mubr.bf16.mxu0 %v2964_v58 }
  0x4a   :  { %617 = vmatmul.mubr.bf16.gmra.mxu0 %v2966_v59 }
  0xe2   :  { %v2591_v60 = vpop.f32.mrf.mxu0 }
  0xe4   :  { %v2592_v61 = vpop.f32.mrf.mxu0  ;;  %v2619_v63 = vpop.f32.mrf.mxu1 }
  0xe5   :  { %v2593_v7 = vadd.f32 %v2592_v61, %v2591_v60 }
  0xe6   :  { %v2594_v62 = vpop.f32.mrf.mxu0  ;;  %v2620_v1 = vpop.f32.mrf.mxu1 }
  0xe7   :  { %v513_v11 = vadd.f32 %v2593_v7, %v126_v8  ;;  %v2621_v12 = vadd.f32 %v2620_v1, %v2619_v63  ;;  %v2967_v8 = vld [vmem:[%s3832_s1 + $0x188] sm:$0xff]  }
  0xe8   :  { %v2595_v0 = vpop.f32.mrf.mxu0  ;;  %v2622_v3 = vpop.f32.mrf.mxu1  ;;  %2720 = vmatprep.subr.bf16.mxu1 %v2967_v8 }
  0xe9   :  { %v2596_v13 = vadd.f32 %v2595_v0, %v2594_v62  ;;  %v562_v19 = vadd.f32 %v2621_v12, %v513_v11  ;;  %2721 = vmatpush3.bf16.msra.mxu1 %v2967_v8 }
  0xea   :  { %v2597_v2 = vpop.f32.mrf.mxu0  ;;  %v2623_v5 = vpop.f32.mrf.mxu1 }
  0xeb   :  { %v516_v20 = vadd.f32 %v2596_v13, %v127_v14  ;;  %v2624_v21 = vadd.f32 %v2623_v5, %v2622_v3 }
  0xec   :  { %v2598_v4 = vpop.f32.mrf.mxu0  ;;  %v2625_v9 = vpop.f32.mrf.mxu1 }
  0xed   :  { %v2599_v17 = vadd.f32 %v2598_v4, %v2597_v2  ;;  %v565_v30 = vadd.f32 %v2624_v21, %v516_v20 }
  0xee   :  { %v2600_v6 = vpop.f32.mrf.mxu0  ;;  %v2626_v15 = vpop.f32.mrf.mxu1 }
  0xef   :  { %v521_v27 = vadd.f32 %v2599_v17, %v128_v22  ;;  %v2627_v28 = vadd.f32 %v2626_v15, %v2625_v9  ;;  %v2968_v9 = vld [vmem:[%s3832_s1 + $0x180] sm:$0xff]  }
  0xf0   :  { %v2601_v10 = vpop.f32.mrf.mxu0  ;;  %v2628_v24 = vpop.f32.mrf.mxu1  ;;  %2722 = vmatprep.subr.bf16.mxu1 %v2968_v9 }
  0xf1   :  { %v2602_v31 = vadd.f32 %v2601_v10, %v2600_v6  ;;  %v570_v38 = vadd.f32 %v2627_v28, %v521_v27  ;;  %2723 = vmatpush3.bf16.msra.mxu1 %v2968_v9  ;;  %v777_v9 = vlaneseq }
  0xf2   :  { %v2629_v35 = vpop.f32.mrf.mxu1 }
  0xf3   :  { %v524_v40 = vadd.f32 %v2602_v31, %v129_v34  ;;  %v2630_v41 = vadd.f32 %v2629_v35, %v2628_v24  ;;  %v2515_v24 = vld [vmem:[%s3834_s2] ss:$0 sm:$0xff] }
  0xf5   :  { %v573_v47 = vadd.f32 %v2630_v41, %v524_v40 }
 0x102   :  { %v2647_v16 = vpop.f32.mrf.mxu0 }
 0x104   :  { %v2648_v18 = vpop.f32.mrf.mxu0 }
 0x105   :  { %v2649_v23 = vadd.f32 %v2648_v18, %v2647_v16 }
 0x106   :  { %v2650_v25 = vpop.f32.mrf.mxu0 }
 0x107   :  { %v3338_v26 = vadd.f32 %v2649_v23, %v562_v19 }
 0x108   :  { %v2651_v29 = vpop.f32.mrf.mxu0 }
 0x109   :  { %v2652_v32 = vadd.f32 %v2651_v29, %v2650_v25  ;;  %v628_v33 = vsel %vm627_vm0, %v3338_v26, 0.0  ;;  %v2516_v29 = vld [vmem:[%s3834_s2 + $0x1] ss:$0 sm:$0xff] }
 0x10a   :  { %v2653_v36 = vpop.f32.mrf.mxu0  ;;  %629 = vadd.xlane.f32.xlu0 %v628_v33 }
 0x10b   :  { %v3345_v37 = vadd.f32 %v2652_v32, %v565_v30 }
 0x10c   :  { %v2654_v39 = vpop.f32.mrf.mxu0 }
 0x10d   :  { %v2655_v42 = vadd.f32 %v2654_v39, %v2653_v36  ;;  %v631_v43 = vsel %vm627_vm0, %v3345_v37, 0.0 }
 0x10e   :  { %v2656_v44 = vpop.f32.mrf.mxu0  ;;  %632 = vadd.xlane.f32.xlu0 %v631_v43 }
 0x10f   :  { %v3349_v45 = vadd.f32 %v2655_v42, %v570_v38 }
 0x110   :  { %v2657_v46 = vpop.f32.mrf.mxu0 }
 0x111   :  { %v2658_v48 = vadd.f32 %v2657_v46, %v2656_v44  ;;  %v634_v49 = vsel %vm627_vm0, %v3349_v45, 0.0  ;;  %v2517_v46 = vld [vmem:[%s3834_s2 + $0x10] ss:$0 sm:$0xff] }
 0x112   :  { %635 = vadd.xlane.f32.xlu1 %v634_v49 }
 0x113   :  { %v3353_v50 = vadd.f32 %v2658_v48, %v573_v47 }
 0x115   :  { %v637_v51 = vsel %vm627_vm0, %v3353_v50, 0.0 }
 0x116   :  { %638 = vadd.xlane.f32.xlu1 %v637_v51 }
 0x193   :  { %v630_v52 = vpop.xlane.xlu0 %629 }
 0x194   :  { %v641_v53 = vmul.f32 0.03125, %v630_v52 }
 0x196   :  { %v645_v54 = vsub.f32 %v3338_v26, %v641_v53 }
 0x197   :  { %v633_v55 = vpop.xlane.xlu0 %632 }
 0x198   :  { %v642_v56 = vmul.f32 0.03125, %v633_v55  ;;  %v649_v57 = vmul.f32 %v645_v54, %v645_v54 }
 0x19a   :  { %v646_v58 = vsub.f32 %v3345_v37, %v642_v56  ;;  %v653_v59 = vsel %vm627_vm0, %v649_v57, 0.0 }
 0x19b   :  { %v636_v60 = vpop.xlane.xlu1 %635  ;;  %654 = vadd.xlane.f32.xlu0 %v653_v59 }
 0x19c   :  { %v643_v61 = vmul.f32 0.03125, %v636_v60  ;;  %v650_v62 = vmul.f32 %v646_v58, %v646_v58 }
 0x19e   :  { %v647_v63 = vsub.f32 %v3349_v45, %v643_v61  ;;  %v656_v0 = vsel %vm627_vm0, %v650_v62, 0.0 }
 0x19f   :  { %v639_v1 = vpop.xlane.xlu1 %638  ;;  %657 = vadd.xlane.f32.xlu1 %v656_v0 }
 0x1a0   :  { %v644_v2 = vmul.f32 0.03125, %v639_v1  ;;  %v651_v3 = vmul.f32 %v647_v63, %v647_v63 }
 0x1a2   :  { %v648_v4 = vsub.f32 %v3353_v50, %v644_v2  ;;  %v659_v5 = vsel %vm627_vm0, %v651_v3, 0.0 }
 0x1a3   :  { %660 = vadd.xlane.f32.xlu0 %v659_v5 }
 0x1a4   :  { %v652_v6 = vmul.f32 %v648_v4, %v648_v4 }
 0x1a6   :  { %v662_v7 = vsel %vm627_vm0, %v652_v6, 0.0 }
 0x1a7   :  { %663 = vadd.xlane.f32.xlu1 %v662_v7 }
 0x224   :  { %v655_v10 = vpop.xlane.xlu0 %654 }
 0x225   :  { %v665_v11 = vmul.f32 0.03125, %v655_v10  ;;  %v3417_v10 = vand.u32 127, %v777_v9 }
 0x227   :  { %v669_v12 = vadd.f32 1e-05, %v665_v11  ;;  %vm779_vm2 = vcmp.lt.s32.totalorder %v3417_v10, 17 }
 0x228   :  { %v658_v13 = vpop.xlane.xlu1 %657 }
 0x229   :  { %2985 = vrsqrt.f32 %v669_v12  ;;  %v666_v14 = vmul.f32 0.03125, %v658_v13 }
 0x22b   :  { %v670_v15 = vadd.f32 1e-05, %v666_v14 }
 0x22c   :  { %v661_v16 = vpop.xlane.xlu0 %660 }
 0x22d   :  { %2987 = vrsqrt.f32 %v670_v15  ;;  %v667_v17 = vmul.f32 0.03125, %v661_v16 }
 0x22f   :  { %v671_v18 = vadd.f32 1e-05, %v667_v17 }
 0x230   :  { %v664_v19 = vpop.xlane.xlu1 %663 }
 0x231   :  { %2989 = vrsqrt.f32 %v671_v18  ;;  %v668_v20 = vmul.f32 0.03125, %v664_v19 }
 0x233   :  { %v672_v21 = vadd.f32 1e-05, %v668_v20 }
 0x235   :  { %2991 = vrsqrt.f32 %v672_v21 }
 0x236   :  { %v2986_v22 = vpop.eup %2985 }
 0x237   :  { %v677_v23 = vmul.f32 %v2986_v22, %v645_v54 }
 0x239   :  { %v685_v28 = vmul.f32 %v2515_v24, %v677_v23 }
 0x23a   :  { %v2988_v25 = vpop.eup %2987 }
 0x23b   :  { %v678_v27 = vmul.f32 %v2988_v25, %v646_v58  ;;  %v693_v33 = vadd.f32 %v2516_v29, %v685_v28 }
 0x23d   :  { %v686_v30 = vmul.f32 %v2515_v24, %v678_v27 }
 0x23e   :  { %v2990_v31 = vpop.eup %2989 }
 0x23f   :  { %v679_v32 = vmul.f32 %v2990_v31, %v647_v63  ;;  %v694_v34 = vadd.f32 %v2516_v29, %v686_v30 }
 0x241   :  { %v697_v35 = vpack.c.bf16 %v694_v34, %v693_v33  ;;  %v687_v39 = vmul.f32 %v2515_v24, %v679_v32 }
 0x242   :  { %v2992_v36 = vpop.eup %2991 }
 0x243   :  { %v680_v38 = vmul.f32 %v2992_v36, %v648_v4  ;;  %2724 = vmatprep.mubr.msk.bf16.mxu1 %vm627_vm0, %v697_v35  ;;  %v695_v41 = vadd.f32 %v2516_v29, %v687_v39 }
 0x245   :  { %v688_v40 = vmul.f32 %v2515_v24, %v680_v38 }
 0x247   :  { %v696_v42 = vadd.f32 %v2516_v29, %v688_v40 }
 0x249   :  { %v698_v43 = vpack.c.bf16 %v696_v42, %v695_v41 }
 0x24b   :  { %2725 = vmatmul.mubr.msk.bf16.vlgmr.msra.gmra.mxu1 %vm627_vm0, %v698_v43 }
 0x30b   :  { %v2726_v44 = vpop.f32.mrf.mxu1 }
 0x30c   :  { %v769_v49 = vadd.f32 %v2726_v44, %v2517_v46 }
 0x30d   :  { %v760_v47 = vpop.f32.mrf.mxu1 }
 0x30e   :  { %v761_v53 = vadd.f32 %v2517_v46, %v760_v47 }
 0x30f   :  { %v2727_v48 = vpop.f32.mrf.mxu1 }
 0x310   :  { %v772_v51 = vadd.f32 %v2727_v48, %v2517_v46 }
 0x311   :  { %v763_v52 = vpop.f32.mrf.mxu1 }
 0x312   :  { %v3382_v54 = vpack.c.bf16 %v772_v51, %v769_v49  ;;  %v764_v55 = vadd.f32 %v2517_v46, %v763_v52 }
 0x314   :  { %v3384_v56 = vpack.c.bf16 %v764_v55, %v761_v53  ;;  %969 = vrot.lane.b32.xlu1 %v3382_v54, %s3107_s22  ;;  %784 = vrot.lane.b32.xlu0 %v3382_v54, %s3108_s23 }
 0x316   :  { %2732 = vmatprep.mubr.msk.bf16.mxu1 %vm786_vm1, %v3384_v56 }
 0x318   :  { %963 = vrot.lane.b32.xlu0 %v3384_v56, %s3109_s24  ;;  %782 = vrot.lane.b32.xlu1 %v3384_v56, %s3108_s23 }
 0x31c   :  { %965 = vrot.lane.b32.xlu0 %v3382_v54, %s3109_s24  ;;  %967 = vrot.lane.b32.xlu1 %v3384_v56, %s3107_s22 }
 0x320   :  { %1147 = vrot.lane.b32.xlu0 %v3384_v56, %s3110_s25  ;;  %1153 = vrot.lane.b32.xlu1 %v3382_v54, %s3111_s26 }
 0x324   :  { %1151 = vrot.lane.b32.xlu1 %v3384_v56, %s3111_s26 }
 0x328   :  { %1149 = vrot.lane.b32.xlu1 %v3382_v54, %s3110_s25 }
 0x386   :  { %v970_v57 = vpop.permute.xlu1 %969  ;;  %v785_v58 = vpop.permute.xlu0 %784 }
 0x387   :  { %2844 = vmatprep.subr.msk.bf16.mxu1 %vm786_vm1, %v785_v58  ;;  %2846 = vmatprep.subr.msk.bf16.mxu0 %vm786_vm1, %v970_v57  ;;  %v797_v59 = vsel %vm786_vm1, %v785_v58, 0  ;;  %v981_v60 = vsel %vm786_vm1, %v970_v57, 0 }
 0x388   :  { %2729 = vmatpush3.bf16.xpose.msra.mxu1 %v797_v59  ;;  %2745 = vmatpush3.bf16.xpose.msra.mxu0 %v981_v60 }
 0x38a   :  { %v964_v61 = vpop.permute.xlu0 %963  ;;  %v783_v62 = vpop.permute.xlu1 %782 }
 0x38b   :  { %2845 = vmatprep.subr.msk.bf16.mxu1 %vm786_vm1, %v783_v62  ;;  %2748 = vmatprep.mubr.msk.bf16.mxu0 %vm786_vm1, %v964_v61  ;;  %v794_v0 = vsel %vm786_vm1, %v783_v62, 0 }
 0x38e   :  { %v968_v63 = vpop.permute.xlu1 %967  ;;  %v966_v2 = vpop.permute.xlu0 %965 }
 0x38f   :  { %2847 = vmatprep.subr.msk.bf16.mxu0 %vm786_vm1, %v968_v63  ;;  %v978_v1 = vsel %vm786_vm1, %v968_v63, 0 }
 0x390   :  { %2731 = vmatpush3.bf16.xpose.msra.mxu1 %v794_v0  ;;  %2747 = vmatpush3.bf16.xpose.msra.mxu0 %v978_v1 }
 0x392   :  { %v1154_v3 = vpop.permute.xlu1 %1153  ;;  %v1148_v4 = vpop.permute.xlu0 %1147 }
 0x393   :  { %2848 = vmatprep.subr.msk.bf16.mxu0 %vm786_vm1, %v1154_v3  ;;  %v1165_v5 = vsel %vm786_vm1, %v1154_v3, 0 }
 0x396   :  { %v1152_v6 = vpop.permute.xlu1 %1151 }
 0x397   :  { %2733 = vmatmul.mubr.msk.bf16.vlgmr.msra.gmra.mxu1 %vm786_vm1, %v3382_v54  ;;  %2749 = vmatmul.mubr.msk.bf16.vlgmr.msra.gmra.mxu0 %vm786_vm1, %v966_v2  ;;  %v1162_v7 = vsel %vm786_vm1, %v1152_v6, 0 }
 0x398   :  { %2761 = vmatpush3.bf16.xpose.msra.mxu0 %v1165_v5  ;;  %2764 = vmatprep.mubr.msk.bf16.mxu0 %vm786_vm1, %v1148_v4 }
 0x399   :  { %2849 = vmatprep.subr.msk.bf16.mxu0 %vm786_vm1, %v1152_v6 }
 0x39a   :  { %v1150_v8 = vpop.permute.xlu1 %1149 }
 0x3a0   :  { %2763 = vmatpush3.bf16.xpose.msra.mxu0 %v1162_v7 }
 0x3a7   :  { %2765 = vmatmul.mubr.msk.bf16.vlgmr.msra.gmra.mxu0 %vm786_vm1, %v1150_v8 }
 0x457   :  { %v2734_v11 = vpop.f32.mrf.mxu1  ;;  %v2750_v12 = vpop.f32.mrf.mxu0 }
 0x458   :  { %v850_v13 = vmul.f32 0.35355338, %v2734_v11  ;;  %v1034_v14 = vmul.f32 0.35355338, %v2750_v12 }
 0x459   :  { %v833_v15 = vpop.f32.mrf.mxu1  ;;  %v1017_v16 = vpop.f32.mrf.mxu0 }
 0x45a   :  { %v854_v17 = vsel %vm779_vm2, %v850_v13, -1e+30  ;;  %v848_v21 = vmul.f32 0.35355338, %v833_v15  ;;  %v1038_v22 = vsel %vm779_vm2, %v1034_v14, -1e+30 }
 0x45b   :  { %v2735_v18 = vpop.f32.mrf.mxu1  ;;  %v2751_v19 = vpop.f32.mrf.mxu0  ;;  %v862_v20 = vsel %vm627_vm0, %v854_v17, -inf  ;;  %v1046_v28 = vsel %vm627_vm0, %v1038_v22, -inf  ;;  %v1032_v29 = vmul.f32 0.35355338, %v1017_v16 }
 0x45c   :  { %863 = vmax.xlane.f32.xlu0 %v862_v20  ;;  %v1035_v24 = vmul.f32 0.35355338, %v2751_v19  ;;  %v852_v31 = vsel %vm779_vm2, %v848_v21, -1e+30  ;;  %v851_v36 = vmul.f32 0.35355338, %v2735_v18 }
 0x45d   :  { %v836_v23 = vpop.f32.mrf.mxu1  ;;  %v1020_v27 = vpop.f32.mrf.mxu0  ;;  %v856_v35 = vsel %vm627_vm0, %v852_v31, -inf  ;;  %v3439_v38 = vsel %vm779_vm2, %v1032_v29, -1e+30 }
 0x45e   :  { %v849_v25 = vmul.f32 0.35355338, %v836_v23  ;;  %v1033_v33 = vmul.f32 0.35355338, %v1020_v27  ;;  %v1039_v34 = vsel %vm779_vm2, %v1035_v24, -1e+30 }
 0x45f   :  { %v1049_v39 = vsel %vm627_vm0, %v1039_v34, -inf  ;;  %v1040_v42 = vsel %vm627_vm0, %v3439_v38, -inf  ;;  %v855_v44 = vsel %vm779_vm2, %v851_v36, -1e+30 }
 0x460   :  { %1047 = vmax.xlane.f32.xlu0 %v1046_v28  ;;  %v3428_v30 = vsel %vm779_vm2, %v849_v25, -1e+30  ;;  %v3444_v40 = vsel %vm779_vm2, %v1033_v33, -1e+30  ;;  %v865_v49 = vsel %vm627_vm0, %v855_v44, -inf }
 0x461   :  { %v859_v32 = vsel %vm627_vm0, %v3428_v30, -inf  ;;  %v1043_v47 = vsel %vm627_vm0, %v3444_v40, -inf }
 0x462   :  { %860 = vmax.xlane.f32.xlu1 %v859_v32 }
 0x464   :  { %857 = vmax.xlane.f32.xlu0 %v856_v35 }
 0x466   :  { %1050 = vmax.xlane.f32.xlu1 %v1049_v39 }
 0x467   :  { %v2766_v41 = vpop.f32.mrf.mxu0 }
 0x468   :  { %v1218_v43 = vmul.f32 0.35355338, %v2766_v41  ;;  %1041 = vmax.xlane.f32.xlu0 %v1040_v42 }
 0x469   :  { %v1201_v46 = vpop.f32.mrf.mxu0 }
 0x46a   :  { %1044 = vmax.xlane.f32.xlu1 %v1043_v47  ;;  %v1216_v51 = vmul.f32 0.35355338, %v1201_v46  ;;  %v3455_v53 = vsel %vm779_vm2, %v1218_v43, -1e+30 }
 0x46b   :  { %v2767_v48 = vpop.f32.mrf.mxu0  ;;  %v1230_v59 = vsel %vm627_vm0, %v3455_v53, -inf }
 0x46c   :  { %v1219_v52 = vmul.f32 0.35355338, %v2767_v48  ;;  %866 = vmax.xlane.f32.xlu0 %v865_v49  ;;  %v3467_v61 = vsel %vm779_vm2, %v1216_v51, -1e+30 }
 0x46d   :  { %v1204_v55 = vpop.f32.mrf.mxu0  ;;  %v1224_v63 = vsel %vm627_vm0, %v3467_v61, -inf }
 0x46e   :  { %v1217_v57 = vmul.f32 0.35355338, %v1204_v55  ;;  %v3459_v58 = vsel %vm779_vm2, %v1219_v52, -1e+30 }
 0x46f   :  { %v1233_v60 = vsel %vm627_vm0, %v3459_v58, -inf }
 0x470   :  { %1231 = vmax.xlane.f32.xlu0 %v1230_v59  ;;  %1234 = vmax.xlane.f32.xlu1 %v1233_v60  ;;  %v3471_v62 = vsel %vm779_vm2, %v1217_v57, -1e+30 }
 0x471   :  { %v1227_v0 = vsel %vm627_vm0, %v3471_v62, -inf }
 0x474   :  { %1225 = vmax.xlane.f32.xlu0 %v1224_v63  ;;  %1228 = vmax.xlane.f32.xlu1 %v1227_v0 }
 0x485   :  { %902 = vrot.lane.b32.xlu1 %v3384_v56, %s3112_s27 }
 0x489   :  { %1088 = vrot.lane.b32.xlu1 %v3382_v54, %s3113_s28 }
 0x48a   :  { %904 = vrot.lane.b32.xlu0 %v3382_v54, %s3112_s27 }
 0x48d   :  { %1086 = vrot.lane.b32.xlu1 %v3384_v56, %s3113_s28 }
 0x4e5   :  { %v864_v1 = vpop.xlane.xlu0 %863 }
 0x4e6   :  { %v870_v2 = vsub.f32 %v854_v17, %v864_v1 }
 0x4e8   :  { %v876_v3 = vmul.f32 1.442695, %v870_v2 }
 0x4e9   :  { %v1048_v4 = vpop.xlane.xlu0 %1047 }
 0x4ea   :  { %2993 = vpow2.f32 %v876_v3  ;;  %v1054_v5 = vsub.f32 %v1038_v22, %v1048_v4 }
 0x4eb   :  { %v861_v6 = vpop.xlane.xlu1 %860 }
 0x4ec   :  { %v1060_v7 = vmul.f32 1.442695, %v1054_v5  ;;  %v869_v17 = vsub.f32 %v3428_v30, %v861_v6 }
 0x4ed   :  { %v858_v8 = vpop.xlane.xlu0 %857 }
 0x4ee   :  { %2995 = vpow2.f32 %v1060_v7  ;;  %v868_v11 = vsub.f32 %v852_v31, %v858_v8  ;;  %v874_v28 = vmul.f32 1.442695, %v869_v17 }
 0x4ef   :  { %v1051_v12 = vpop.xlane.xlu1 %1050 }
 0x4f0   :  { %v872_v13 = vmul.f32 1.442695, %v868_v11  ;;  %v1055_v15 = vsub.f32 %v1039_v34, %v1051_v12 }
 0x4f1   :  { %v3481_v14 = vpop.xlane.xlu0 %1041 }
 0x4f2   :  { %2997 = vpow2.f32 %v872_v13  ;;  %v1062_v21 = vmul.f32 1.442695, %v1055_v15  ;;  %v1052_v63 = vsub.f32 %v3439_v38, %v3481_v14 }
 0x4f3   :  { %v1045_v16 = vpop.xlane.xlu1 %1044 }
 0x4f4   :  { %v1053_v29 = vsub.f32 %v3444_v40, %v1045_v16  ;;  %v1056_v0 = vmul.f32 1.442695, %v1052_v63 }
 0x4f5   :  { %v867_v18 = vpop.xlane.xlu0 %866 }
 0x4f6   :  { %v871_v19 = vsub.f32 %v855_v44, %v867_v18  ;;  %v1058_v34 = vmul.f32 1.442695, %v1053_v29 }
 0x4f7   :  { %v3483_v20 = vpop.eup %2993 }
 0x4f8   :  { %v878_v22 = vmul.f32 1.442695, %v871_v19  ;;  %v886_v23 = vsel %vm627_vm0, %v3483_v20, 0.0 }
 0x4f9   :  { %887 = vadd.xlane.f32.xlu0 %v886_v23  ;;  %v1232_v24 = vpop.xlane.xlu0 %1231  ;;  %v1235_v25 = vpop.xlane.xlu1 %1234 }
 0x4fa   :  { %2999 = vpow2.f32 %v878_v22  ;;  %v1239_v35 = vsub.f32 %v3459_v58, %v1235_v25  ;;  %v1238_v1 = vsub.f32 %v3455_v53, %v1232_v24 }
 0x4fb   :  { %v3488_v27 = vpop.eup %2995  ;;  %3001 = vpow2.f32 %v1062_v21 }
 0x4fc   :  { %v1070_v31 = vsel %vm627_vm0, %v3488_v27, 0.0  ;;  %3003 = vpow2.f32 %v874_v28  ;;  %v1246_v40 = vmul.f32 1.442695, %v1239_v35  ;;  %v1244_v2 = vmul.f32 1.442695, %v1238_v1 }
 0x4fd   :  { %1071 = vadd.xlane.f32.xlu0 %v1070_v31  ;;  %v1226_v30 = vpop.xlane.xlu0 %1225  ;;  %v1229_v32 = vpop.xlane.xlu1 %1228  ;;  %3005 = vpow2.f32 %v1058_v34 }
 0x4fe   :  { %v1237_v42 = vsub.f32 %v3471_v62, %v1229_v32  ;;  %3007 = vpow2.f32 %v1246_v40  ;;  %v1236_v3 = vsub.f32 %v3467_v61, %v1226_v30 }
 0x4ff   :  { %v3493_v33 = vpop.eup %2997 }
 0x500   :  { %v880_v36 = vsel %vm627_vm0, %v3493_v33, 0.0  ;;  %v1242_v46 = vmul.f32 1.442695, %v1237_v42  ;;  %v1240_v4 = vmul.f32 1.442695, %v1236_v3 }
 0x501   :  { %881 = vadd.xlane.f32.xlu0 %v880_v36  ;;  %v905_v39 = vpop.permute.xlu0 %904  ;;  %v903_v41 = vpop.permute.xlu1 %902 }
 0x502   :  { %2736 = vmatprep.subr.bf16.mxu1 %v905_v39  ;;  %3009 = vpow2.f32 %v1242_v46 }
 0x503   :  { %2737 = vmatpush3.bf16.msra.mxu1 %v905_v39  ;;  %3011 = vpow2.f32 %v1056_v0 }
 0x504   :  { %2738 = vmatprep.subr.bf16.mxu1 %v903_v41  ;;  %3013 = vpow2.f32 %v1244_v2 }
 0x505   :  { %v3501_v44 = vpop.permute.xlu1 %1088  ;;  %3015 = vpow2.f32 %v1240_v4 }
 0x507   :  { %v3499_v43 = vpop.eup %2999  ;;  %2739 = vmatpush3.bf16.msra.mxu1 %v903_v41 }
 0x508   :  { %2752 = vmatprep.subr.bf16.mxu1 %v3501_v44  ;;  %v889_v47 = vsel %vm627_vm0, %v3499_v43, 0.0  ;;  %v3506_v48 = vpop.eup %3001 }
 0x509   :  { %890 = vadd.xlane.f32.xlu1 %v889_v47  ;;  %v1073_v49 = vsel %vm627_vm0, %v3506_v48, 0.0  ;;  %v3004_v51 = vpop.eup %3003  ;;  %v1087_v11 = vpop.permute.xlu1 %1086 }
 0x50a   :  { %v883_v52 = vsel %vm627_vm0, %v3004_v51, 0.0  ;;  %v3511_v55 = vpop.eup %3005 }
 0x50b   :  { %v1067_v57 = vsel %vm627_vm0, %v3511_v55, 0.0  ;;  %v3515_v58 = vpop.eup %3007 }
 0x50c   :  { %v1257_v59 = vsel %vm627_vm0, %v3515_v58, 0.0 }
 0x50d   :  { %1074 = vadd.xlane.f32.xlu1 %v1073_v49 }
 0x50f   :  { %v3520_v60 = vpop.eup %3009 }
 0x510   :  { %v1251_v62 = vsel %vm627_vm0, %v3520_v60, 0.0  ;;  %v3012_v5 = vpop.eup %3011 }
 0x511   :  { %884 = vadd.xlane.f32.xlu1 %v883_v52  ;;  %v1064_v6 = vsel %vm627_vm0, %v3012_v5, 0.0  ;;  %v3531_v38 = vpop.eup %3013 }
 0x512   :  { %v1254_v53 = vsel %vm627_vm0, %v3531_v38, 0.0  ;;  %v3536_v61 = vpop.eup %3015 }
 0x513   :  { %v1248_v7 = vsel %vm627_vm0, %v3536_v61, 0.0 }
 0x515   :  { %1068 = vadd.xlane.f32.xlu1 %v1067_v57 }
 0x517   :  { %1272 = vrot.lane.b32.xlu0 %v3382_v54, %s3114_s29 }
 0x519   :  { %1258 = vadd.xlane.f32.xlu1 %v1257_v59 }
 0x51d   :  { %1252 = vadd.xlane.f32.xlu1 %v1251_v62 }
 0x52e   :  { %1270 = vrot.lane.b32.xlu1 %v3384_v56, %s3114_s29 }
 0x532   :  { %1335 = vrot.lane.b32.xlu1 %v3384_v56, %s3115_s30 }
 0x536   :  { %1065 = vadd.xlane.f32.xlu0 %v1064_v6  ;;  %1333 = vrot.lane.b32.xlu1 %v3382_v54, %s3116_s5 }
 0x53a   :  { %1255 = vadd.xlane.f32.xlu0 %v1254_v53 }
 0x53e   :  { %1249 = vadd.xlane.f32.xlu0 %v1248_v7 }
 0x554   :  { %1337 = vrot.lane.b32.xlu0 %v3382_v54, %s3115_s30 }
 0x558   :  { %1331 = vrot.lane.b32.xlu0 %v3384_v56, %s3116_s5 }
 0x582   :  { %v888_v8 = vpop.xlane.xlu0 %887 }
 0x586   :  { %v1072_v12 = vpop.xlane.xlu0 %1071 }
 0x58a   :  { %v882_v14 = vpop.xlane.xlu0 %881 }
 0x58e   :  { %v1273_v31 = vpop.permute.xlu0 %1272 }
 0x592   :  { %v891_v13 = vpop.xlane.xlu1 %890 }
 0x593   :  { %3017 = vrcp.f32 %v891_v13 }
 0x594   :  { %3019 = vrcp.f32 %v882_v14 }
 0x595   :  { %3021 = vrcp.f32 %v888_v8 }
 0x596   :  { %v1075_v15 = vpop.xlane.xlu1 %1074 }
 0x59a   :  { %v885_v16 = vpop.xlane.xlu1 %884 }
 0x59b   :  { %3023 = vrcp.f32 %v885_v16 }
 0x59c   :  { %3025 = vrcp.f32 %v1075_v15 }
 0x59e   :  { %v1069_v30 = vpop.xlane.xlu1 %1068 }
 0x59f   :  { %3027 = vrcp.f32 %v1069_v30 }
 0x5a0   :  { %v3018_v18 = vpop.eup %3017  ;;  %3029 = vrcp.f32 %v1072_v12 }
 0x5a1   :  { %v3020_v19 = vpop.eup %3019  ;;  %v899_v22 = vmul.f32 %v3018_v18, %v3499_v43 }
 0x5a2   :  { %v3022_v17 = vpop.eup %3021  ;;  %v896_v23 = vmul.f32 %v3020_v19, %v3493_v33  ;;  %v1259_v32 = vpop.xlane.xlu1 %1258 }
 0x5a3   :  { %v898_v25 = vmul.f32 %v3022_v17, %v3483_v20 }
 0x5a5   :  { %v901_v29 = vpack.c.bf16 %v899_v22, %v898_v25 }
 0x5a6   :  { %v1253_v20 = vpop.xlane.xlu1 %1252 }
 0x5a8   :  { %v3024_v21 = vpop.eup %3023 }
 0x5a9   :  { %v897_v24 = vmul.f32 %v3024_v21, %v3004_v51  ;;  %v3026_v36 = vpop.eup %3025 }
 0x5aa   :  { %v1083_v42 = vmul.f32 %v3026_v36, %v3506_v48  ;;  %v1271_v59 = vpop.permute.xlu1 %1270 }
 0x5ab   :  { %v900_v28 = vpack.c.bf16 %v897_v24, %v896_v23 }
 0x5ac   :  { %v3028_v39 = vpop.eup %3027 }
 0x5ad   :  { %2740 = vmatprep.mubr.msk.bf16.mxu1 %vm627_vm0, %v900_v28  ;;  %v3030_v41 = vpop.eup %3029 }
 0x5ae   :  { %2741 = vmatmul.mubr.msk.bf16.vlgmr.msra.gmra.mxu1 %vm627_vm0, %v901_v29  ;;  %v1082_v46 = vmul.f32 %v3030_v41, %v3488_v27 }
 0x5af   :  { %2753 = vmatpush3.bf16.msra.mxu1 %v3501_v44  ;;  %v1081_v44 = vmul.f32 %v3028_v39, %v3511_v55 }
 0x5b0   :  { %2754 = vmatprep.subr.bf16.mxu1 %v1087_v11  ;;  %v1085_v49 = vpack.c.bf16 %v1083_v42, %v1082_v46 }
 0x5b3   :  { %2755 = vmatpush3.bf16.msra.mxu1 %v1087_v11 }
 0x5b4   :  { %2768 = vmatprep.subr.bf16.mxu1 %v1273_v31 }
 0x5bf   :  { %v1066_v33 = vpop.xlane.xlu0 %1065 }
 0x5c0   :  { %3031 = vrcp.f32 %v1066_v33 }
 0x5c3   :  { %v1256_v34 = vpop.xlane.xlu0 %1255 }
 0x5c4   :  { %3033 = vrcp.f32 %v1256_v34 }
 0x5c5   :  { %3035 = vrcp.f32 %v1253_v20 }
 0x5c6   :  { %3037 = vrcp.f32 %v1259_v32 }
 0x5c7   :  { %v1250_v35 = vpop.xlane.xlu0 %1249 }
 0x5c8   :  { %3039 = vrcp.f32 %v1250_v35 }
 0x5cb   :  { %v1338_v63 = vpop.permute.xlu0 %1337 }
 0x5cc   :  { %v1349_v3 = vsel %vm786_vm1, %v1338_v63, 0 }
 0x5cd   :  { %v3032_v40 = vpop.eup %3031 }
 0x5ce   :  { %v1080_v43 = vmul.f32 %v3032_v40, %v3012_v5  ;;  %v1336_v5 = vpop.permute.xlu1 %1335 }
 0x5cf   :  { %v1332_v4 = vpop.permute.xlu0 %1331 }
 0x5d0   :  { %v1084_v47 = vpack.c.bf16 %v1081_v44, %v1080_v43 }
 0x5d1   :  { %v3034_v51 = vpop.eup %3033 }
 0x5d2   :  { %2756 = vmatprep.mubr.msk.bf16.mxu1 %vm627_vm0, %v1084_v47  ;;  %v3036_v52 = vpop.eup %3035  ;;  %v1266_v48 = vmul.f32 %v3034_v51, %v3531_v38 }
 0x5d3   :  { %2757 = vmatmul.mubr.msk.bf16.vlgmr.msra.gmra.mxu1 %vm627_vm0, %v1085_v49  ;;  %v3038_v57 = vpop.eup %3037  ;;  %v1265_v27 = vmul.f32 %v3036_v52, %v3520_v60  ;;  %v1334_v60 = vpop.permute.xlu1 %1333 }
 0x5d4   :  { %2769 = vmatpush3.bf16.msra.mxu1 %v1273_v31  ;;  %v1267_v0 = vmul.f32 %v3038_v57, %v3515_v58  ;;  %v1346_v58 = vsel %vm786_vm1, %v1336_v5, 0 }
 0x5d5   :  { %v3040_v62 = vpop.eup %3039  ;;  %2770 = vmatprep.subr.bf16.mxu1 %v1271_v59 }
 0x5d6   :  { %v1264_v55 = vmul.f32 %v3040_v62, %v3536_v61  ;;  %v1269_v2 = vpack.c.bf16 %v1267_v0, %v1266_v48 }
 0x5d8   :  { %2771 = vmatpush3.bf16.msra.mxu1 %v1271_v59  ;;  %v1268_v1 = vpack.c.bf16 %v1265_v27, %v1264_v55 }
 0x5d9   :  { %2850 = vmatprep.subr.msk.bf16.mxu1 %vm786_vm1, %v1338_v63 }
 0x5da   :  { %2772 = vmatprep.mubr.msk.bf16.mxu1 %vm627_vm0, %v1268_v1 }
 0x5db   :  { %2773 = vmatmul.mubr.msk.bf16.vlgmr.msra.gmra.mxu1 %vm627_vm0, %v1269_v2 }
 0x5dc   :  { %2777 = vmatpush3.bf16.xpose.msra.mxu1 %v1349_v3  ;;  %2780 = vmatprep.mubr.msk.bf16.mxu1 %vm786_vm1, %v1332_v4 }
 0x5dd   :  { %2851 = vmatprep.subr.msk.bf16.mxu1 %vm786_vm1, %v1336_v5 }
 0x5e4   :  { %2779 = vmatpush3.bf16.xpose.msra.mxu1 %v1346_v58 }
 0x5eb   :  { %2781 = vmatmul.mubr.msk.bf16.vlgmr.msra.gmra.mxu1 %vm786_vm1, %v1334_v60 }
 0x66e   :  { %v3565_v6 = vpop.f32.mrf.mxu1 }
 0x670   :  { %v3567_v38 = vpop.f32.mrf.mxu1 }
 0x672   :  { %v3569_v53 = vpop.f32.mrf.mxu1 }
 0x674   :  { %v3571_v61 = vpop.f32.mrf.mxu1 }
 0x693   :  { %v3573_v7 = vpop.f32.mrf.mxu1 }
 0x695   :  { %v3575_v8 = vpop.f32.mrf.mxu1 }
 0x697   :  { %v3577_v11 = vpop.f32.mrf.mxu1 }
 0x698   :  { %v2874_v12 = vpack.i.bf16 %v3577_v11, %v3573_v7 }
 0x699   :  { %v1135_v13 = vpop.f32.mrf.mxu1 }
 0x69a   :  { %v2869_v14 = vpack.i.bf16 %v1135_v13, %v3575_v8 }
 0x69b   :  { %v2774_v15 = vpop.f32.mrf.mxu1 }
 0x69d   :  { %v1316_v16 = vpop.f32.mrf.mxu1 }
 0x69f   :  { %v2775_v18 = vpop.f32.mrf.mxu1 }
 0x6a0   :  { %v2884_v19 = vpack.i.bf16 %v2775_v18, %v2774_v15 }
 0x6a1   :  { %v1319_v17 = vpop.f32.mrf.mxu1 }
 0x6a2   :  { %v2879_v21 = vpack.i.bf16 %v1319_v17, %v1316_v16  ;;  %v2970_v17 = vld [vmem:[%s3832_s1 + $0x190] sm:$0xff]  }
 0x6ab   :  { %v2782_v22 = vpop.f32.mrf.mxu1 }
 0x6ac   :  { %v1402_v24 = vmul.f32 0.35355338, %v2782_v22 }
 0x6ad   :  { %v1385_v23 = vpop.f32.mrf.mxu1 }
 0x6ae   :  { %v1400_v25 = vmul.f32 0.35355338, %v1385_v23  ;;  %v1406_v20 = vsel %vm779_vm2, %v1402_v24, -1e+30 }
 0x6af   :  { %v2783_v28 = vpop.f32.mrf.mxu1  ;;  %v1414_v35 = vsel %vm627_vm0, %v1406_v20, -inf }
 0x6b0   :  { %v1404_v29 = vsel %vm779_vm2, %v1400_v25, -1e+30  ;;  %v1403_v32 = vmul.f32 0.35355338, %v2783_v28 }
 0x6b1   :  { %v1388_v31 = vpop.f32.mrf.mxu1  ;;  %v1408_v30 = vsel %vm627_vm0, %v1404_v29, -inf }
 0x6b2   :  { %v1401_v33 = vmul.f32 0.35355338, %v1388_v31  ;;  %1409 = vmax.xlane.f32.xlu0 %v1408_v30  ;;  %v1407_v39 = vsel %vm779_vm2, %v1403_v32, -1e+30 }
 0x6b3   :  { %v1417_v41 = vsel %vm627_vm0, %v1407_v39, -inf }
 0x6b4   :  { %v1405_v34 = vsel %vm779_vm2, %v1401_v33, -1e+30 }
 0x6b5   :  { %v1411_v36 = vsel %vm627_vm0, %v1405_v34, -inf }
 0x6b6   :  { %1415 = vmax.xlane.f32.xlu0 %v1414_v35  ;;  %1412 = vmax.xlane.f32.xlu1 %v1411_v36 }
 0x6ba   :  { %1418 = vmax.xlane.f32.xlu0 %v1417_v41 }
 0x73b   :  { %v1410_v40 = vpop.xlane.xlu0 %1409 }
 0x73c   :  { %v1420_v42 = vsub.f32 %v1404_v29, %v1410_v40 }
 0x73e   :  { %v1424_v47 = vmul.f32 1.442695, %v1420_v42 }
 0x73f   :  { %v1416_v43 = vpop.xlane.xlu0 %1415  ;;  %v1413_v44 = vpop.xlane.xlu1 %1412 }
 0x740   :  { %v1422_v46 = vsub.f32 %v1406_v20, %v1416_v43  ;;  %v1421_v51 = vsub.f32 %v1405_v34, %v1413_v44 }
 0x742   :  { %v1428_v49 = vmul.f32 1.442695, %v1422_v46  ;;  %v1426_v59 = vmul.f32 1.442695, %v1421_v51 }
 0x743   :  { %v1419_v52 = vpop.xlane.xlu0 %1418 }
 0x744   :  { %3041 = vpow2.f32 %v1428_v49  ;;  %v1423_v57 = vsub.f32 %v1407_v39, %v1419_v52 }
 0x745   :  { %3043 = vpow2.f32 %v1424_v47 }
 0x746   :  { %v1430_v62 = vmul.f32 1.442695, %v1423_v57 }
 0x748   :  { %3045 = vpow2.f32 %v1430_v62 }
 0x749   :  { %3047 = vpow2.f32 %v1426_v59 }
 0x751   :  { %v3042_v10 = vpop.eup %3041 }
 0x752   :  { %v1438_v63 = vsel %vm627_vm0, %v3042_v10, 0.0  ;;  %v3044_v48 = vpop.eup %3043 }
 0x753   :  { %1439 = vadd.xlane.f32.xlu0 %v1438_v63  ;;  %v1432_v27 = vsel %vm627_vm0, %v3044_v48, 0.0 }
 0x755   :  { %v3046_v55 = vpop.eup %3045 }
 0x756   :  { %v1441_v0 = vsel %vm627_vm0, %v3046_v55, 0.0  ;;  %v3048_v1 = vpop.eup %3047 }
 0x757   :  { %1433 = vadd.xlane.f32.xlu0 %v1432_v27  ;;  %1442 = vadd.xlane.f32.xlu1 %v1441_v0  ;;  %v1435_v2 = vsel %vm627_vm0, %v3048_v1, 0.0 }
 0x75b   :  { %1436 = vadd.xlane.f32.xlu1 %v1435_v2 }
 0x76c   :  { %1454 = vrot.lane.b32.xlu1 %v3384_v56, %s3117_s6 }
 0x76d   :  { %1456 = vrot.lane.b32.xlu0 %v3382_v54, %s3117_s6 }
 0x770   :  { %2870 = vrot.lane.b32.xlu1 %v2869_v14, %s3118_s0 }
 0x771   :  { %2880 = vrot.lane.b32.xlu0 %v2879_v21, %s3119_s7 }
 0x774   :  { %2875 = vrot.lane.b32.xlu1 %v2874_v12, %s3118_s0 }
 0x778   :  { %2885 = vrot.lane.b32.xlu1 %v2884_v19, %s3119_s7  ;;  %v2969_v19 = vld [vmem:[%s3832_s1 + $0x198] sm:$0xff]  }
 0x779   :  { %2792 = vmatprep.subr.bf16.mxu0 %v2969_v19 }
 0x77a   :  { %2793 = vmatpush3.bf16.msra.mxu0 %v2969_v19 }
 0x77b   :  { %2794 = vmatprep.subr.bf16.mxu0 %v2970_v17 }
 0x77e   :  { %2795 = vmatpush3.bf16.msra.mxu0 %v2970_v17 }
 0x7dc   :  { %v1440_v3 = vpop.xlane.xlu0 %1439 }
 0x7e0   :  { %v1434_v4 = vpop.xlane.xlu0 %1433  ;;  %v1443_v5 = vpop.xlane.xlu1 %1442 }
 0x7e1   :  { %3049 = vrcp.f32 %v1443_v5 }
 0x7e2   :  { %3051 = vrcp.f32 %v1434_v4  ;;  %v2542_v4 = vld [vmem:[%s3834_s2 + $0x2] ss:$0 sm:$0xff] }
 0x7e3   :  { %3053 = vrcp.f32 %v1440_v3 }
 0x7e4   :  { %v1457_v58 = vpop.permute.xlu0 %1456  ;;  %v1437_v60 = vpop.xlane.xlu1 %1436 }
 0x7e5   :  { %3055 = vrcp.f32 %v1437_v60  ;;  %2784 = vmatprep.subr.bf16.mxu1 %v1457_v58 }
 0x7e6   :  { %2785 = vmatpush3.bf16.msra.mxu1 %v1457_v58 }
 0x7e8   :  { %v1455_v54 = vpop.permute.xlu1 %1454  ;;  %v2881_v20 = vpop.permute.xlu0 %2880 }
 0x7e9   :  { %2786 = vmatprep.subr.bf16.mxu1 %v1455_v54  ;;  %v2883_v46 = vunpack.i.h.bf16 %v2881_v20  ;;  %v2882_v47 = vunpack.i.l.bf16 %v2881_v20 }
 0x7ea   :  { %2787 = vmatpush3.bf16.msra.mxu1 %v1455_v54 }
 0x7ec   :  { %v2871_v29 = vpop.permute.xlu1 %2870 }
 0x7ed   :  { %v2873_v30 = vunpack.i.h.bf16 %v2871_v29  ;;  %v2872_v33 = vunpack.i.l.bf16 %v2871_v29 }
 0x7ee   :  { %v3050_v56 = vpop.eup %3049 }
 0x7ef   :  { %v3052_v8 = vpop.eup %3051  ;;  %v1451_v11 = vmul.f32 %v3050_v56, %v3046_v55  ;;  %v1564_v41 = vsel %vm786_vm1, %v3571_v61, %v2873_v30  ;;  %v1563_v42 = vsel %vm786_vm1, %v3567_v38, %v2872_v33 }
 0x7f0   :  { %v3054_v13 = vpop.eup %3053  ;;  %v1448_v12 = vmul.f32 %v3052_v8, %v3044_v48  ;;  %v2876_v31 = vpop.permute.xlu1 %2875  ;;  %v1568_v63 = vsel %vm1567_vm3, %v1563_v42, %v2882_v47  ;;  %v1569_v48 = vsel %vm1567_vm3, %v1564_v41, %v2883_v46 }
 0x7f1   :  { %v1450_v15 = vmul.f32 %v3054_v13, %v3042_v10  ;;  %v2878_v34 = vunpack.i.h.bf16 %v2876_v31  ;;  %v2877_v35 = vunpack.i.l.bf16 %v2876_v31 }
 0x7f2   :  { %v3056_v7 = vpop.eup %3055 }
 0x7f3   :  { %v1449_v14 = vmul.f32 %v3056_v7, %v3048_v1  ;;  %v1453_v18 = vpack.c.bf16 %v1451_v11, %v1450_v15  ;;  %v1566_v49 = vsel %vm786_vm1, %v3569_v53, %v2878_v34  ;;  %v1565_v51 = vsel %vm786_vm1, %v3565_v6, %v2877_v35  ;;  %v2971_v34 = vld [vmem:[%s3832_s1 + $0x1a8] sm:$0xff]   ;;  %v2972_v35 = vld [vmem:[%s3832_s1 + $0x1a0] sm:$0xff]  }
 0x7f4   :  { %v2886_v32 = vpop.permute.xlu1 %2885  ;;  %2800 = vmatprep.subr.bf16.mxu1 %v2971_v34 }
 0x7f5   :  { %v1452_v16 = vpack.c.bf16 %v1449_v14, %v1448_v12  ;;  %v2888_v36 = vunpack.i.h.bf16 %v2886_v32  ;;  %v2887_v39 = vunpack.i.l.bf16 %v2886_v32 }
 0x7f7   :  { %2788 = vmatprep.mubr.msk.bf16.mxu1 %vm627_vm0, %v1452_v16  ;;  %v1570_v57 = vsel %vm1567_vm3, %v1565_v51, %v2887_v39  ;;  %v1571_v61 = vsel %vm1567_vm3, %v1566_v49, %v2888_v36 }
 0x7f8   :  { %2789 = vmatmul.mubr.msk.bf16.vlgmr.msra.gmra.mxu1 %vm627_vm0, %v1453_v18 }
 0x7f9   :  { %2801 = vmatpush3.bf16.msra.mxu1 %v2971_v34 }
 0x7fa   :  { %2802 = vmatprep.subr.bf16.mxu1 %v2972_v35 }
 0x7fd   :  { %2803 = vmatpush3.bf16.msra.mxu1 %v2972_v35 }
 0x8b8   :  { %v2790_v21 = vpop.f32.mrf.mxu1 }
 0x8ba   :  { %v1500_v22 = vpop.f32.mrf.mxu1 }
 0x8bc   :  { %v2791_v23 = vpop.f32.mrf.mxu1 }
 0x8bd   :  { %v2894_v24 = vpack.i.bf16 %v2791_v23, %v2790_v21 }
 0x8be   :  { %v1503_v25 = vpop.f32.mrf.mxu1 }
 0x8bf   :  { %v2889_v28 = vpack.i.bf16 %v1503_v25, %v1500_v22  ;;  %2895 = vrot.lane.b32.xlu1 %v2894_v24, %s3120_s12 }
 0x8c1   :  { %2890 = vrot.lane.b32.xlu0 %v2889_v28, %s3120_s12 }
 0x931   :  { %v2896_v40 = vpop.permute.xlu1 %2895 }
 0x932   :  { %v2898_v43 = vunpack.i.h.bf16 %v2896_v40  ;;  %v2897_v44 = vunpack.i.l.bf16 %v2896_v40 }
 0x933   :  { %v2891_v52 = vpop.permute.xlu0 %2890 }
 0x934   :  { %v2893_v59 = vunpack.i.h.bf16 %v2891_v52  ;;  %v2892_v62 = vunpack.i.l.bf16 %v2891_v52  ;;  %v1575_v38 = vsel %vm1572_vm4, %v1570_v57, %v2897_v44  ;;  %v1576_v10 = vsel %vm1572_vm4, %v1571_v61, %v2898_v43 }
 0x935   :  { %v1578_v27 = vpack.c.bf16 %v1576_v10, %v1575_v38 }
 0x936   :  { %v1573_v53 = vsel %vm1572_vm4, %v1568_v63, %v2892_v62  ;;  %v1574_v55 = vsel %vm1572_vm4, %v1569_v48, %v2893_v59  ;;  %v2543_v59 = vld [vmem:[%s3834_s2 + $0x3] ss:$0 sm:$0xff] }
 0x937   :  { %v1577_v6 = vpack.c.bf16 %v1574_v55, %v1573_v53  ;;  %v2544_v53 = vld [vmem:[%s3834_s2 + $0x4] ss:$0 sm:$0xff] }
 0x939   :  { %2796 = vmatprep.mubr.msk.bf16.mxu0 %vm627_vm0, %v1577_v6 }
 0x93a   :  { %2797 = vmatmul.mubr.msk.bf16.vlgmr.msra.gmra.mxu0 %vm627_vm0, %v1578_v27 }
 0x9fa   :  { %v2798_v0 = vpop.f32.mrf.mxu0 }
 0x9fb   :  { %v1652_v2 = vadd.f32 %v2798_v0, %v3349_v45 }
 0x9fc   :  { %v1635_v1 = vpop.f32.mrf.mxu0 }
 0x9fd   :  { %v1650_v3 = vadd.f32 %v1635_v1, %v3338_v26  ;;  %v3636_v54 = vadd.f32 %v2542_v4, %v1652_v2 }
 0x9fe   :  { %v2799_v5 = vpop.f32.mrf.mxu0 }
 0x9ff   :  { %v3634_v58 = vadd.f32 %v2542_v4, %v1650_v3  ;;  %v1653_v56 = vadd.f32 %v2799_v5, %v3353_v50  ;;  %v1671_v7 = vsel %vm627_vm0, %v3636_v54, 0.0 }
 0xa00   :  { %v1638_v60 = vpop.f32.mrf.mxu0 }
 0xa01   :  { %v1651_v8 = vadd.f32 %v1638_v60, %v3345_v37  ;;  %v1665_v13 = vsel %vm627_vm0, %v3634_v58, 0.0  ;;  %v3644_v26 = vadd.f32 %v2542_v4, %v1653_v56 }
 0xa02   :  { %1666 = vadd.xlane.f32.xlu0 %v1665_v13  ;;  %v2974_v13 = vld [vmem:[%s3832_s1 + $0x1e0] sm:$0xff]  }
 0xa03   :  { %v3642_v45 = vadd.f32 %v2542_v4, %v1651_v8  ;;  %v1674_v50 = vsel %vm627_vm0, %v3644_v26, 0.0  ;;  %v2973_v8 = vld [vmem:[%s3832_s1 + $0x1e8] sm:$0xff]  }
 0xa04   :  { %2808 = vmatprep.subr.bf16.mxu0 %v2973_v8 }
 0xa05   :  { %v1668_v11 = vsel %vm627_vm0, %v3642_v45, 0.0  ;;  %2809 = vmatpush3.bf16.msra.mxu0 %v2973_v8 }
 0xa06   :  { %1672 = vadd.xlane.f32.xlu0 %v1671_v7  ;;  %1669 = vadd.xlane.f32.xlu1 %v1668_v11  ;;  %v2975_v7 = vld [vmem:[%s3832_s1 + $0x1d8] sm:$0xff]   ;;  %v2976_v11 = vld [vmem:[%s3832_s1 + $0x1d0] sm:$0xff]  }
 0xa07   :  { %2810 = vmatprep.subr.bf16.mxu0 %v2974_v13 }
 0xa09   :  { %2811 = vmatpush3.bf16.msra.mxu0 %v2974_v13  ;;  %v2558_v13 = vld [vmem:[%s3834_s2 + $0x5] ss:$0 sm:$0xff] }
 0xa0a   :  { %1675 = vadd.xlane.f32.xlu0 %v1674_v50  ;;  %2812 = vmatprep.subr.bf16.mxu0 %v2975_v7  ;;  %v2977_v50 = vld [vmem:[%s3832_s1 + $0x1c8] sm:$0xff]  }
 0xa0d   :  { %2813 = vmatpush3.bf16.msra.mxu0 %v2975_v7 }
 0xa0e   :  { %2814 = vmatprep.subr.bf16.mxu0 %v2976_v11 }
 0xa11   :  { %2815 = vmatpush3.bf16.msra.mxu0 %v2976_v11 }
 0xa12   :  { %2816 = vmatprep.subr.bf16.mxu0 %v2977_v50 }
 0xa15   :  { %2817 = vmatpush3.bf16.msra.mxu0 %v2977_v50 }
 0xa8b   :  { %v1667_v37 = vpop.xlane.xlu0 %1666 }
 0xa8c   :  { %v1677_v12 = vmul.f32 0.03125, %v1667_v37  ;;  %v2978_v37 = vld [vmem:[%s3832_s1 + $0x1c0] sm:$0xff]  }
 0xa8d   :  { %2818 = vmatprep.subr.bf16.mxu0 %v2978_v37 }
 0xa8e   :  { %v1681_v14 = vsub.f32 %v3634_v58, %v1677_v12  ;;  %2819 = vmatpush3.bf16.msra.mxu0 %v2978_v37  ;;  %v2979_v12 = vld [vmem:[%s3832_s1 + $0x1b8] sm:$0xff]  }
 0xa8f   :  { %v1673_v15 = vpop.xlane.xlu0 %1672  ;;  %v1670_v16 = vpop.xlane.xlu1 %1669  ;;  %2820 = vmatprep.subr.bf16.mxu0 %v2979_v12 }
 0xa90   :  { %v1679_v18 = vmul.f32 0.03125, %v1673_v15  ;;  %v1678_v19 = vmul.f32 0.03125, %v1670_v16  ;;  %v1685_v17 = vmul.f32 %v1681_v14, %v1681_v14  ;;  %v2545_v15 = vld [vmem:[%s3834_s2 + $0x11] ss:$0 sm:$0xff] }
 0xa92   :  { %v1683_v21 = vsub.f32 %v3636_v54, %v1679_v18  ;;  %v1682_v22 = vsub.f32 %v3642_v45, %v1678_v19  ;;  %v1689_v23 = vsel %vm627_vm0, %v1685_v17, 0.0  ;;  %2821 = vmatpush3.bf16.msra.mxu0 %v2979_v12 }
 0xa93   :  { %1690 = vadd.xlane.f32.xlu0 %v1689_v23  ;;  %v1676_v24 = vpop.xlane.xlu0 %1675 }
 0xa94   :  { %v1680_v25 = vmul.f32 0.03125, %v1676_v24  ;;  %v1687_v28 = vmul.f32 %v1683_v21, %v1683_v21  ;;  %v1686_v29 = vmul.f32 %v1682_v22, %v1682_v22 }
 0xa96   :  { %v1684_v31 = vsub.f32 %v3644_v26, %v1680_v25  ;;  %v1695_v30 = vsel %vm627_vm0, %v1687_v28, 0.0  ;;  %v1692_v32 = vsel %vm627_vm0, %v1686_v29, 0.0 }
 0xa97   :  { %1696 = vadd.xlane.f32.xlu0 %v1695_v30  ;;  %1693 = vadd.xlane.f32.xlu1 %v1692_v32 }
 0xa98   :  { %v1688_v33 = vmul.f32 %v1684_v31, %v1684_v31 }
 0xa9a   :  { %v1698_v20 = vsel %vm627_vm0, %v1688_v33, 0.0 }
 0xa9b   :  { %1699 = vadd.xlane.f32.xlu1 %v1698_v20 }
 0xb1c   :  { %v1691_v36 = vpop.xlane.xlu0 %1690 }
 0xb1d   :  { %v1701_v39 = vmul.f32 0.03125, %v1691_v36 }
 0xb1f   :  { %v1705_v41 = vadd.f32 1e-05, %v1701_v39 }
 0xb20   :  { %v1697_v40 = vpop.xlane.xlu0 %1696  ;;  %v1694_v42 = vpop.xlane.xlu1 %1693 }
 0xb21   :  { %3057 = vrsqrt.f32 %v1705_v41  ;;  %v1703_v43 = vmul.f32 0.03125, %v1697_v40  ;;  %v1702_v44 = vmul.f32 0.03125, %v1694_v42 }
 0xb23   :  { %v1707_v46 = vadd.f32 1e-05, %v1703_v43  ;;  %v1706_v47 = vadd.f32 1e-05, %v1702_v44 }
 0xb24   :  { %v1700_v49 = vpop.xlane.xlu1 %1699 }
 0xb25   :  { %3059 = vrsqrt.f32 %v1707_v46  ;;  %v1704_v51 = vmul.f32 0.03125, %v1700_v49 }
 0xb26   :  { %3061 = vrsqrt.f32 %v1706_v47 }
 0xb27   :  { %v1708_v52 = vadd.f32 1e-05, %v1704_v51 }
 0xb29   :  { %3063 = vrsqrt.f32 %v1708_v52 }
 0xb2e   :  { %v3058_v57 = vpop.eup %3057 }
 0xb2f   :  { %v1713_v61 = vmul.f32 %v3058_v57, %v1681_v14  ;;  %v2980_v14 = vld [vmem:[%s3832_s1 + $0x1b0] sm:$0xff]  }
 0xb30   :  { %2822 = vmatprep.subr.bf16.mxu0 %v2980_v14 }
 0xb31   :  { %v1721_v48 = vmul.f32 %v2543_v59, %v1713_v61  ;;  %2823 = vmatpush3.bf16.msra.mxu0 %v2980_v14 }
 0xb32   :  { %v3060_v62 = vpop.eup %3059 }
 0xb33   :  { %v3062_v38 = vpop.eup %3061  ;;  %v1715_v10 = vmul.f32 %v3060_v62, %v1683_v21  ;;  %v1729_v1 = vadd.f32 %v2544_v53, %v1721_v48 }
 0xb34   :  { %v1714_v63 = vmul.f32 %v3062_v38, %v1682_v22 }
 0xb35   :  { %v1723_v0 = vmul.f32 %v2543_v59, %v1715_v10 }
 0xb36   :  { %v3064_v55 = vpop.eup %3063  ;;  %v1722_v6 = vmul.f32 %v2543_v59, %v1714_v63 }
 0xb37   :  { %v1716_v27 = vmul.f32 %v3064_v55, %v1684_v31  ;;  %v1731_v5 = vadd.f32 %v2544_v53, %v1723_v0 }
 0xb38   :  { %v1730_v2 = vadd.f32 %v2544_v53, %v1722_v6 }
 0xb39   :  { %v1724_v3 = vmul.f32 %v2543_v59, %v1716_v27 }
 0xb3a   :  { %v1733_v4 = vpack.c.bf16 %v1730_v2, %v1729_v1 }
 0xb3b   :  { %v1732_v60 = vadd.f32 %v2544_v53, %v1724_v3 }
 0xb3c   :  { %2804 = vmatprep.mubr.msk.bf16.mxu1 %vm627_vm0, %v1733_v4 }
 0xb3d   :  { %v1734_v56 = vpack.c.bf16 %v1732_v60, %v1731_v5 }
 0xb3f   :  { %2805 = vmatmul.mubr.msk.bf16.vlgmr.msra.gmra.mxu1 %vm627_vm0, %v1734_v56 }
 0xbff   :  { %v2806_v16 = vpop.f32.mrf.mxu1 }
 0xc00   :  { %v1805_v18 = vadd.f32 %v2806_v16, %v2545_v15 }
 0xc01   :  { %v1796_v19 = vpop.f32.mrf.mxu1 }
 0xc02   :  { %v1813_v17 = vmul.f32 %v1805_v18, %v1805_v18  ;;  %v1797_v21 = vadd.f32 %v2545_v15, %v1796_v19 }
 0xc03   :  { %v2807_v22 = vpop.f32.mrf.mxu1 }
 0xc04   :  { %v1817_v23 = vmul.f32 %v1813_v17, %v1805_v18  ;;  %v1811_v24 = vmul.f32 %v1797_v21, %v1797_v21  ;;  %v1808_v25 = vadd.f32 %v2807_v22, %v2545_v15 }
 0xc05   :  { %v1799_v28 = vpop.f32.mrf.mxu1 }
 0xc06   :  { %v1821_v29 = vmul.f32 0.044715, %v1817_v23  ;;  %v1815_v31 = vmul.f32 %v1811_v24, %v1797_v21  ;;  %v1814_v30 = vmul.f32 %v1808_v25, %v1808_v25  ;;  %v1800_v32 = vadd.f32 %v2545_v15, %v1799_v28 }
 0xc08   :  { %v1825_v33 = vadd.f32 %v1821_v29, %v1805_v18  ;;  %v1819_v20 = vmul.f32 0.044715, %v1815_v31  ;;  %v1818_v34 = vmul.f32 %v1814_v30, %v1808_v25  ;;  %v1812_v35 = vmul.f32 %v1800_v32, %v1800_v32 }
 0xc0a   :  { %v1829_v36 = vmul.f32 0.7978846, %v1825_v33  ;;  %v1823_v39 = vadd.f32 %v1819_v20, %v1797_v21  ;;  %v1822_v41 = vmul.f32 0.044715, %v1818_v34  ;;  %v1816_v40 = vmul.f32 %v1812_v35, %v1800_v32 }
 0xc0c   :  { %v1827_v42 = vmul.f32 0.7978846, %v1823_v39  ;;  %v1826_v43 = vadd.f32 %v1822_v41, %v1808_v25  ;;  %v1820_v44 = vmul.f32 0.044715, %v1816_v40  ;;  %3065 = vtanh.f32 %v1829_v36 }
 0xc0e   :  { %3067 = vtanh.f32 %v1827_v42  ;;  %v1830_v46 = vmul.f32 0.7978846, %v1826_v43  ;;  %v1824_v47 = vadd.f32 %v1820_v44, %v1800_v32 }
 0xc10   :  { %3069 = vtanh.f32 %v1830_v46  ;;  %v1828_v49 = vmul.f32 0.7978846, %v1824_v47 }
 0xc12   :  { %3071 = vtanh.f32 %v1828_v49 }
 0xc19   :  { %v3066_v51 = vpop.eup %3065 }
 0xc1a   :  { %v1837_v59 = vadd.f32 1.0, %v3066_v51 }
 0xc1b   :  { %v3068_v52 = vpop.eup %3067 }
 0xc1c   :  { %v1835_v57 = vadd.f32 1.0, %v3068_v52  ;;  %v1841_v53 = vmul.f32 0.5, %v1837_v59  ;;  %v2046_v59 = vshrl.u32 %v777_v9, 7 }
 0xc1d   :  { %v3070_v61 = vpop.eup %3069 }
 0xc1e   :  { %v1838_v62 = vadd.f32 1.0, %v3070_v61  ;;  %v1839_v48 = vmul.f32 0.5, %v1835_v57  ;;  %v1845_v1 = vmul.f32 %v1841_v53, %v1805_v18  ;;  %v3723_v53 = vsub.s32 0, %v2046_v59 }
 0xc1f   :  { %v3072_v38 = vpop.eup %3071 }
 0xc20   :  { %v1842_v10 = vmul.f32 0.5, %v1838_v62  ;;  %v1836_v63 = vadd.f32 1.0, %v3072_v38  ;;  %v1843_v27 = vmul.f32 %v1839_v48, %v1797_v21  ;;  %v2559_v38 = vld [vmem:[%s3834_s2 + $0x6] ss:$0 sm:$0xff] }
 0xc22   :  { %v1840_v55 = vmul.f32 0.5, %v1836_v63  ;;  %v1846_v6 = vmul.f32 %v1842_v10, %v1808_v25  ;;  %v2560_v63 = vld [vmem:[%s3834_s2 + $0x7] ss:$0 sm:$0xff] }
 0xc24   :  { %v1844_v0 = vmul.f32 %v1840_v55, %v1800_v32  ;;  %v1848_v3 = vpack.c.bf16 %v1846_v6, %v1845_v1 }
 0xc26   :  { %v1847_v2 = vpack.c.bf16 %v1844_v0, %v1843_v27 }
 0xc28   :  { %2824 = vmatprep.mubr.bf16.mxu0 %v1847_v2 }
 0xc29   :  { %2825 = vmatmul.mubr.bf16.vlgmr.msra.gmra.mxu0 %v1848_v3 }
 0xce9   :  { %v2826_v4 = vpop.f32.mrf.mxu0 }
 0xcea   :  { %v1964_v60 = vadd.f32 %v2826_v4, %v3636_v54 }
 0xceb   :  { %v1947_v5 = vpop.f32.mrf.mxu0 }
 0xcec   :  { %v1962_v56 = vadd.f32 %v1947_v5, %v3634_v58  ;;  %v1973_v14 = vadd.f32 %v2558_v13, %v1964_v60 }
 0xced   :  { %v2827_v8 = vpop.f32.mrf.mxu0 }
 0xcee   :  { %v1971_v7 = vadd.f32 %v2558_v13, %v1962_v56  ;;  %v1965_v50 = vadd.f32 %v2827_v8, %v3644_v26  ;;  %v1983_v54 = vsel %vm627_vm0, %v1973_v14, 0.0 }
 0xcef   :  { %v1950_v11 = vpop.f32.mrf.mxu0 }
 0xcf0   :  { %v1963_v37 = vadd.f32 %v1950_v11, %v3642_v45  ;;  %v1977_v12 = vsel %vm627_vm0, %v1971_v7, 0.0  ;;  %v1974_v16 = vadd.f32 %v2558_v13, %v1965_v50 }
 0xcf1   :  { %1978 = vadd.xlane.f32.xlu0 %v1977_v12 }
 0xcf2   :  { %v1972_v15 = vadd.f32 %v2558_v13, %v1963_v37  ;;  %v1986_v18 = vsel %vm627_vm0, %v1974_v16, 0.0 }
 0xcf4   :  { %v1980_v58 = vsel %vm627_vm0, %v1972_v15, 0.0 }
 0xcf5   :  { %1984 = vadd.xlane.f32.xlu0 %v1983_v54  ;;  %1981 = vadd.xlane.f32.xlu1 %v1980_v58  ;;  %v2981_v58 = vld [vmem:[%s3832_s1 + $0x208] sm:$0xff]  }
 0xcf9   :  { %1987 = vadd.xlane.f32.xlu1 %v1986_v18  ;;  %v2982_v18 = vld [vmem:[%s3832_s1 + $0x200] sm:$0xff]  }
 0xd7a   :  { %v1979_v19 = vpop.xlane.xlu0 %1978 }
 0xd7b   :  { %v1989_v17 = vmul.f32 0.03125, %v1979_v19  ;;  %v2123_v19 = vld [vmem:[%s3835_s3] sm:$0x1] }
 0xd7d   :  { %v1993_v26 = vsub.f32 %v1971_v7, %v1989_v17  ;;  %v2124_v17 = vpack.c.bf16 %v2123_v19, %v2123_v19 }
 0xd7e   :  { %v1985_v21 = vpop.xlane.xlu0 %1984  ;;  %v1982_v45 = vpop.xlane.xlu1 %1981 }
 0xd7f   :  { %v1991_v22 = vmul.f32 0.03125, %v1985_v21  ;;  %v1990_v23 = vmul.f32 0.03125, %v1982_v45  ;;  %v1997_v24 = vmul.f32 %v1993_v26, %v1993_v26 }
 0xd81   :  { %v1995_v25 = vsub.f32 %v1973_v14, %v1991_v22  ;;  %v1994_v28 = vsub.f32 %v1972_v15, %v1990_v23  ;;  %v2001_v29 = vsel %vm627_vm0, %v1997_v24, 0.0 }
 0xd82   :  { %2002 = vadd.xlane.f32.xlu0 %v2001_v29  ;;  %v1988_v31 = vpop.xlane.xlu1 %1987 }
 0xd83   :  { %v1992_v30 = vmul.f32 0.03125, %v1988_v31  ;;  %v1999_v32 = vmul.f32 %v1995_v25, %v1995_v25  ;;  %v1998_v33 = vmul.f32 %v1994_v28, %v1994_v28 }
 0xd85   :  { %v1996_v20 = vsub.f32 %v1974_v16, %v1992_v30  ;;  %v2007_v34 = vsel %vm627_vm0, %v1999_v32, 0.0  ;;  %v2004_v35 = vsel %vm627_vm0, %v1998_v33, 0.0  ;;  %v3121_v16 = vmov 0.0  }
 0xd86   :  { %2008 = vadd.xlane.f32.xlu0 %v2007_v34  ;;  %2005 = vadd.xlane.f32.xlu1 %v2004_v35 }
 0xd87   :  { %v2000_v36 = vmul.f32 %v1996_v20, %v1996_v20  ;;  %2828 = vmatprep.subr.bf16.mxu1 %v3121_v16  ;;  %2832 = vmatprep.mubr.msk.bf16.mxu1 %vm3122_vm5, %v3121_v16 }
 0xd88   :  { %2829 = vmatpush3.bf16.msra.mxu1 %v2981_v58 }
 0xd89   :  { %v2010_v39 = vsel %vm627_vm0, %v2000_v36, 0.0  ;;  %2830 = vmatprep.subr.bf16.mxu1 %v3121_v16 }
 0xd8a   :  { %2011 = vadd.xlane.f32.xlu1 %v2010_v39 }
 0xd8c   :  { %2831 = vmatpush3.bf16.msra.mxu1 %v2982_v18 }
 0xd8f   :  { %2833 = vmatmul.mubr.msk.bf16.vlgmr.msra.gmra.mxu1 %vm627_vm0, %v2124_v17 }
 0xe0b   :  { %v2003_v41 = vpop.xlane.xlu0 %2002 }
 0xe0c   :  { %v2013_v40 = vmul.f32 0.03125, %v2003_v41 }
 0xe0e   :  { %v2017_v42 = vadd.f32 1e-05, %v2013_v40 }
 0xe0f   :  { %v2009_v43 = vpop.xlane.xlu0 %2008  ;;  %v2006_v44 = vpop.xlane.xlu1 %2005 }
 0xe10   :  { %3073 = vrsqrt.f32 %v2017_v42  ;;  %v2015_v46 = vmul.f32 0.03125, %v2009_v43  ;;  %v2014_v47 = vmul.f32 0.03125, %v2006_v44  ;;  %v2983_v42 = vld [vmem:[%s3832_s1 + $0x1f8] sm:$0xff]   ;;  %v2984_v43 = vld [vmem:[%s3832_s1 + $0x1f0] sm:$0xff]   ;;  %v2129_v44 = vld [vmem:[%s3834_s2 + $0xa] sm:$0x1] }
 0xe11   :  { %2836 = vmatprep.subr.bf16.mxu1 %v2983_v42 }
 0xe12   :  { %v2019_v49 = vadd.f32 1e-05, %v2015_v46  ;;  %v2018_v51 = vadd.f32 1e-05, %v2014_v47  ;;  %2837 = vmatpush3.bf16.msra.mxu1 %v2983_v42 }
 0xe13   :  { %v2012_v52 = vpop.xlane.xlu1 %2011  ;;  %2838 = vmatprep.subr.bf16.mxu1 %v2984_v43 }
 0xe14   :  { %3075 = vrsqrt.f32 %v2019_v49  ;;  %v2016_v57 = vmul.f32 0.03125, %v2012_v52 }
 0xe15   :  { %3077 = vrsqrt.f32 %v2018_v51 }
 0xe16   :  { %v2020_v61 = vadd.f32 1e-05, %v2016_v57  ;;  %2839 = vmatpush3.bf16.msra.mxu1 %v2984_v43  ;;  %v2571_v43 = vld [vmem:[%s3834_s2 + $0xc] ss:$0 sm:$0xff] }
 0xe18   :  { %3079 = vrsqrt.f32 %v2020_v61 }
 0xe1d   :  { %v3074_v62 = vpop.eup %3073 }
 0xe1e   :  { %v2025_v10 = vmul.f32 %v3074_v62, %v1993_v26 }
 0xe20   :  { %v2033_v48 = vmul.f32 %v2559_v38, %v2025_v10 }
 0xe21   :  { %v3076_v55 = vpop.eup %3075 }
 0xe22   :  { %v3078_v6 = vpop.eup %3077  ;;  %v2041_v27 = vadd.f32 %v2560_v63, %v2033_v48  ;;  %v2027_v0 = vmul.f32 %v3076_v55, %v1995_v25 }
 0xe23   :  { %v2026_v1 = vmul.f32 %v3078_v6, %v1994_v28 }
 0xe24   :  { %v2048_v9 = vrot.slane %v2041_v27, %v3723_v53  ;;  %v2035_v2 = vmul.f32 %v2559_v38, %v2027_v0 }
 0xe25   :  { %v3080_v3 = vpop.eup %3079  ;;  %v2034_v4 = vmul.f32 %v2559_v38, %v2026_v1 }
 0xe26   :  { %v2049_v5 = vmul.f32 %v2048_v9, %v2041_v27  ;;  %v2043_v60 = vadd.f32 %v2560_v63, %v2035_v2  ;;  %v2028_v56 = vmul.f32 %v3080_v3, %v1996_v20 }
 0xe27   :  { %v2042_v8 = vadd.f32 %v2560_v63, %v2034_v4  ;;  %v2561_v4 = vld [vmem:[%s3834_s2 + $0x8] ss:$0 sm:$0xff] }
 0xe28   :  { %v2055_v13 = vsel %vm627_vm0, %v2049_v5, 0.0  ;;  %v2051_v7 = vmul.f32 %v2048_v9, %v2043_v60  ;;  %v2036_v11 = vmul.f32 %v2559_v38, %v2028_v56 }
 0xe29   :  { %2056 = vadd.xlane.f32.xlu0 %v2055_v13  ;;  %v2050_v50 = vmul.f32 %v2048_v9, %v2042_v8 }
 0xe2a   :  { %v2044_v37 = vadd.f32 %v2560_v63, %v2036_v11  ;;  %v2061_v14 = vsel %vm627_vm0, %v2051_v7, 0.0 }
 0xe2b   :  { %v2058_v12 = vsel %vm627_vm0, %v2050_v50, 0.0 }
 0xe2c   :  { %2059 = vadd.xlane.f32.xlu1 %v2058_v12  ;;  %v2052_v15 = vmul.f32 %v2048_v9, %v2044_v37 }
 0xe2d   :  { %2062 = vadd.xlane.f32.xlu0 %v2061_v14 }
 0xe2e   :  { %v2064_v54 = vsel %vm627_vm0, %v2052_v15, 0.0 }
 0xe30   :  { %2065 = vadd.xlane.f32.xlu1 %v2064_v54 }
 0xe4f   :  { %v2179_v46 = vpop.f32.mrf.mxu1 }
 0xe50   :  { %v3753_v47 = vadd.f32 %v2179_v46, %v2129_v44 }
 0xe51   :  { %v2834_v49 = vpop.f32.mrf.mxu1 }
 0xe52   :  { %v2371_v51 = vmul.f32 %v3753_v47, %v3753_v47 }
 0xe53   :  { %v2182_v52 = vpop.f32.mrf.mxu1 }
 0xe54   :  { %v2373_v57 = vsel %vm2372_vm6, %v2371_v51, 0.0 }
 0xe55   :  { %v2835_v61 = vpop.f32.mrf.mxu1 }
 0xeb2   :  { %v2057_v26 = vpop.xlane.xlu0 %2056 }
 0xeb3   :  { %v2067_v21 = vmul.f32 0.03125, %v2057_v26  ;;  %v2566_v26 = vld [vmem:[%s3834_s2 + $0xb] ss:$0 sm:$0xff] }
 0xeb5   :  { %v2071_v45 = vsub.f32 %v2049_v5, %v2067_v21  ;;  %v2060_v22 = vpop.xlane.xlu1 %2059 }
 0xeb6   :  { %v2068_v23 = vmul.f32 0.03125, %v2060_v22  ;;  %v2063_v24 = vpop.xlane.xlu0 %2062 }
 0xeb7   :  { %v2069_v25 = vmul.f32 0.03125, %v2063_v24  ;;  %v2075_v28 = vmul.f32 %v2071_v45, %v2071_v45 }
 0xeb8   :  { %v2072_v29 = vsub.f32 %v2050_v50, %v2068_v23 }
 0xeb9   :  { %v2073_v31 = vsub.f32 %v2051_v7, %v2069_v25  ;;  %v2066_v30 = vpop.xlane.xlu1 %2065  ;;  %v2079_v32 = vsel %vm627_vm0, %v2075_v28, 0.0  ;;  %v2562_v7 = vld [vmem:[%s3834_s2 + $0x9] ss:$0 sm:$0xff] }
 0xeba   :  { %v2070_v33 = vmul.f32 0.03125, %v2066_v30  ;;  %2080 = vadd.xlane.f32.xlu0 %v2079_v32  ;;  %v2076_v20 = vmul.f32 %v2072_v29, %v2072_v29  ;;  %v2573_v32 = vld [vmem:[%s3834_s2 + $0xd] ss:$0 sm:$0xff] }
 0xebb   :  { %v2077_v34 = vmul.f32 %v2073_v31, %v2073_v31 }
 0xebc   :  { %v2074_v35 = vsub.f32 %v2052_v15, %v2070_v33  ;;  %v2082_v36 = vsel %vm627_vm0, %v2076_v20, 0.0 }
 0xebd   :  { %2083 = vadd.xlane.f32.xlu1 %v2082_v36  ;;  %v2085_v39 = vsel %vm627_vm0, %v2077_v34, 0.0 }
 0xebe   :  { %2086 = vadd.xlane.f32.xlu0 %v2085_v39  ;;  %v2078_v41 = vmul.f32 %v2074_v35, %v2074_v35 }
 0xec0   :  { %v2088_v40 = vsel %vm627_vm0, %v2078_v41, 0.0 }
 0xec1   :  { %2089 = vadd.xlane.f32.xlu1 %v2088_v40 }
 0xec2   :  { %2374 = vadd.xlane.f32.xlu0 %v2373_v57 }
 0xf43   :  { %v2081_v59 = vpop.xlane.xlu0 %2080 }
 0xf44   :  { %v2091_v62 = vmul.f32 0.03125, %v2081_v59 }
 0xf46   :  { %v2095_v38 = vadd.f32 1e-05, %v2091_v62  ;;  %v2084_v10 = vpop.xlane.xlu1 %2083 }
 0xf47   :  { %v2092_v63 = vmul.f32 0.03125, %v2084_v10  ;;  %v2087_v48 = vpop.xlane.xlu0 %2086 }
 0xf48   :  { %3081 = vrsqrt.f32 %v2095_v38  ;;  %v2093_v55 = vmul.f32 0.03125, %v2087_v48 }
 0xf49   :  { %v2096_v6 = vadd.f32 1e-05, %v2092_v63 }
 0xf4a   :  { %v2097_v27 = vadd.f32 1e-05, %v2093_v55  ;;  %v2090_v0 = vpop.xlane.xlu1 %2089 }
 0xf4b   :  { %3083 = vrsqrt.f32 %v2096_v6  ;;  %v2094_v1 = vmul.f32 0.03125, %v2090_v0  ;;  %v2375_v48 = vpop.xlane.xlu0 %2374 }
 0xf4c   :  { %3085 = vrsqrt.f32 %v2097_v27  ;;  %v2376_v55 = vadd.f32 1e-06, %v2375_v48 }
 0xf4d   :  { %v2098_v9 = vadd.f32 1e-05, %v2094_v1 }
 0xf4f   :  { %3087 = vrsqrt.f32 %v2098_v9 }
 0xf50   :  { %3089 = vrsqrt.f32 %v2376_v55 }
 0xf55   :  { %v3082_v2 = vpop.eup %3081 }
 0xf56   :  { %v2103_v3 = vmul.f32 %v3082_v2, %v2071_v45 }
 0xf58   :  { %v3084_v5 = vpop.eup %3083  ;;  %v2111_v8 = vmul.f32 %v2561_v4, %v2103_v3 }
 0xf59   :  { %v3086_v60 = vpop.eup %3085  ;;  %v2104_v56 = vmul.f32 %v3084_v5, %v2072_v29 }
 0xf5a   :  { %v2105_v13 = vmul.f32 %v3086_v60, %v2073_v31  ;;  %v2119_v14 = vadd.f32 %v2562_v7, %v2111_v8 }
 0xf5b   :  { %v2112_v11 = vmul.f32 %v2561_v4, %v2104_v56 }
 0xf5c   :  { %v3088_v50 = vpop.eup %3087  ;;  %v2113_v37 = vmul.f32 %v2561_v4, %v2105_v13  ;;  %v2298_v36 = vmul.f32 %v2573_v32, %v2119_v14  ;;  %v2268_v51 = vmul.f32 %v2571_v43, %v2119_v14 }
 0xf5d   :  { %v2106_v12 = vmul.f32 %v3088_v50, %v2074_v35  ;;  %v2120_v15 = vadd.f32 %v2562_v7, %v2112_v11  ;;  %v3090_v5 = vpop.eup %3089 }
 0xf5e   :  { %v2121_v16 = vadd.f32 %v2562_v7, %v2113_v37  ;;  %v2302_v41 = vsel %vm627_vm0, %v2298_v36, 0.0  ;;  %v2272_v57 = vsel %vm627_vm0, %v2268_v51, 0.0  ;;  %v2378_v60 = vmul.f32 %v3090_v5, %v3753_v47  ;;  %v2572_v36 = vld [vmem:[%s3834_s2 + $0xe] ss:$0 sm:$0xff] }
 0xf5f   :  { %v2114_v54 = vmul.f32 %v2561_v4, %v2106_v12  ;;  %v2185_v58 = vpack.c.bf16 %v2120_v15, %v2119_v14  ;;  %v2299_v40 = vmul.f32 %v2573_v32, %v2120_v15  ;;  %v2269_v61 = vmul.f32 %v2571_v43, %v2120_v15 }
 0xf60   :  { %v2300_v42 = vmul.f32 %v2573_v32, %v2121_v16  ;;  %v2270_v59 = vmul.f32 %v2571_v43, %v2121_v16  ;;  %v2382_v13 = vrot.slane %v2378_v60, %v3723_v53 }
 0xf61   :  { %2840 = vmatprep.mubr.msk.bf16.mxu1 %vm627_vm0, %v2185_v58  ;;  %v2122_v18 = vadd.f32 %v2562_v7, %v2114_v54  ;;  %v2305_v44 = vsel %vm627_vm0, %v2299_v40, 0.0  ;;  %v2275_v62 = vsel %vm627_vm0, %v2269_v61, 0.0 }
 0xf62   :  { %v2308_v46 = vsel %vm627_vm0, %v2300_v42, 0.0  ;;  %v2278_v38 = vsel %vm627_vm0, %v2270_v59, 0.0 }
 0xf63   :  { %v2186_v19 = vpack.c.bf16 %v2122_v18, %v2121_v16  ;;  %v2301_v49 = vmul.f32 %v2573_v32, %v2122_v18  ;;  %v2271_v10 = vmul.f32 %v2571_v43, %v2122_v18 }
 0xf65   :  { %2841 = vmatmul.mubr.msk.bf16.vlgmr.msra.gmra.mxu1 %vm627_vm0, %v2186_v19  ;;  %v2311_v52 = vsel %vm627_vm0, %v2301_v49, 0.0  ;;  %v2281_v63 = vsel %vm627_vm0, %v2271_v10, 0.0 }
0x1025   :  { %v2842_v17 = vpop.f32.mrf.mxu1 }
0x1026   :  { %v3768_v45 = vadd.f32 %v2842_v17, %v2566_v26 }
0x1027   :  { %v2248_v21 = vpop.f32.mrf.mxu1 }
0x1028   :  { %v2249_v22 = vadd.f32 %v2566_v26, %v2248_v21  ;;  %v2345_v30 = vmul.f32 %v3768_v45, %v3768_v45  ;;  %v2574_v21 = vld [vmem:[%s3834_s2 + $0xf] ss:$0 sm:$0xff] }
0x1029   :  { %v2843_v23 = vpop.f32.mrf.mxu1 }
0x102a   :  { %v2343_v24 = vmul.f32 %v2249_v22, %v2249_v22  ;;  %v3770_v28 = vadd.f32 %v2843_v23, %v2566_v26  ;;  %v2353_v34 = vsel %vm627_vm0, %v2345_v30, 0.0 }
0x102b   :  { %v2251_v25 = vpop.f32.mrf.mxu1 }
0x102c   :  { %v3772_v29 = vadd.f32 %v2566_v26, %v2251_v25  ;;  %v2347_v31 = vsel %vm627_vm0, %v2343_v24, 0.0  ;;  %v2346_v35 = vmul.f32 %v3770_v28, %v3770_v28  ;;  %v3123_v26 = vmov 0  }
0x102d   :  { %2348 = vadd.xlane.f32.xlu1 %v2347_v31  ;;  %2900 = vset.pattern.permute.xlu0 %v3123_v26 }
0x102e   :  { %v2344_v33 = vmul.f32 %v3772_v29, %v3772_v29  ;;  %v2356_v39 = vsel %vm627_vm0, %v2346_v35, 0.0  ;;  %2899 = vset.pattern.permute.xlu1 %v3123_v26 }
0x1030   :  { %v2350_v20 = vsel %vm627_vm0, %v2344_v33, 0.0 }
0x1031   :  { %2351 = vadd.xlane.f32.xlu0 %v2350_v20  ;;  %2354 = vadd.xlane.f32.xlu1 %v2353_v34 }
0x1035   :  { %2357 = vadd.xlane.f32.xlu0 %v2356_v39  ;;  %2303 = vadd.xlane.f32.xlu1 %v2302_v41 }
0x1039   :  { %2306 = vadd.xlane.f32.xlu0 %v2305_v44  ;;  %2309 = vadd.xlane.f32.xlu1 %v2308_v46 }
0x103d   :  { %2312 = vadd.xlane.f32.xlu0 %v2311_v52  ;;  %2273 = vadd.xlane.f32.xlu1 %v2272_v57 }
0x1041   :  { %2276 = vadd.xlane.f32.xlu0 %v2275_v62  ;;  %2279 = vadd.xlane.f32.xlu1 %v2278_v38 }
0x1045   :  { %2282 = vadd.xlane.f32.xlu0 %v2281_v63 }
0x10b6   :  { %v2349_v6 = vpop.xlane.xlu1 %2348 }
0x10b7   :  { %v2359_v27 = vadd.f32 1e-06, %v2349_v6 }
0x10b9   :  { %3091 = vrsqrt.f32 %v2359_v27 }
0x10ba   :  { %v2352_v0 = vpop.xlane.xlu0 %2351  ;;  %v2355_v1 = vpop.xlane.xlu1 %2354 }
0x10bb   :  { %v2360_v9 = vadd.f32 1e-06, %v2352_v0  ;;  %v2361_v2 = vadd.f32 1e-06, %v2355_v1 }
0x10bd   :  { %3093 = vrsqrt.f32 %v2360_v9 }
0x10be   :  { %3095 = vrsqrt.f32 %v2361_v2  ;;  %v2358_v3 = vpop.xlane.xlu0 %2357 }
0x10bf   :  { %v2362_v4 = vadd.f32 1e-06, %v2358_v3 }
0x10c1   :  { %3097 = vrsqrt.f32 %v2362_v4 }
0x10c2   :  { %v2307_v23 = vpop.xlane.xlu0 %2306 }
0x10c3   :  { %v2320_v25 = vadd.f32 %v2574_v21, %v2307_v23  ;;  %v2444_v23 = vld [vmem:[%s3834_s2 + $0x12] sm:$0x1] }
0x10c5   :  { %v2333_v31 = vmul.f32 1.442695, %v2320_v25  ;;  %v2328_v61 = vadd.f32 1.0, %v2320_v25  ;;  %vm2324_vm8 = vcmp.gt.f32.partialorder %v2320_v25, 0.0 }
0x10c6   :  { %v3092_v56 = vpop.eup %3091 }
0x10c7   :  { %v2367_v8 = vmul.f32 %v3092_v56, %v2249_v22 }
0x10c9   :  { %v2383_v7 = vmul.f32 %v2382_v13, %v2367_v8 }
0x10ca   :  { %v3094_v11 = vpop.eup %3093 }
0x10cb   :  { %v3096_v50 = vpop.eup %3095  ;;  %v2387_v37 = vsel %vm627_vm0, %v2383_v7, 0.0  ;;  %v2368_v12 = vmul.f32 %v3094_v11, %v3772_v29  ;;  %v2313_v29 = vpop.xlane.xlu0 %2312  ;;  %v2407_v11 = vld [vmem:[%s3834_s2 + $0x38] sm:$0xff] }
0x10cc   :  { %2388 = vadd.xlane.f32.xlu0 %v2387_v37  ;;  %v2369_v14 = vmul.f32 %v3096_v50, %v3768_v45  ;;  %v2304_v45 = vpop.xlane.xlu1 %2303  ;;  %v2322_v20 = vadd.f32 %v2574_v21, %v2313_v29  ;;  %v2409_v50 = vld [vmem:[%s3834_s2 + $0x48] sm:$0xff] }
0x10cd   :  { %v2384_v54 = vmul.f32 %v2382_v13, %v2368_v12  ;;  %v2319_v22 = vadd.f32 %v2574_v21, %v2304_v45 }
0x10ce   :  { %v3098_v15 = vpop.eup %3097  ;;  %v2385_v16 = vmul.f32 %v2382_v13, %v2369_v14  ;;  %v2337_v34 = vmul.f32 1.442695, %v2322_v20  ;;  %v2330_v5 = vadd.f32 1.0, %v2322_v20  ;;  %vm2326_vm10 = vcmp.gt.f32.partialorder %v2322_v20, 0.0 }
0x10cf   :  { %v2370_v58 = vmul.f32 %v3098_v15, %v3770_v28  ;;  %v2390_v47 = vsel %vm627_vm0, %v2384_v54, 0.0  ;;  %v2331_v24 = vmul.f32 1.442695, %v2319_v22  ;;  %v2277_v32 = vpop.xlane.xlu0 %2276  ;;  %v2327_v42 = vadd.f32 1.0, %v2319_v22  ;;  %v2410_v54 = vld [vmem:[%s3834_s2 + $0x50] sm:$0xff] }
0x10d0   :  { %2391 = vadd.xlane.f32.xlu1 %v2390_v47  ;;  %v2393_v17 = vsel %vm627_vm0, %v2385_v16, 0.0  ;;  %v2310_v28 = vpop.xlane.xlu1 %2309  ;;  %vm2323_vm7 = vcmp.gt.f32.partialorder %v2319_v22, 0.0  ;;  %v2290_v57 = vadd.f32 %v2572_v36, %v2277_v32 }
0x10d1   :  { %v2386_v18 = vmul.f32 %v2382_v13, %v2370_v58  ;;  %3099 = vpow2.f32 %v2331_v24  ;;  %v2321_v30 = vadd.f32 %v2574_v21, %v2310_v28  ;;  %v2408_v13 = vld [vmem:[%s3834_s2 + $0x40] sm:$0xff] }
0x10d2   :  { %3101 = vpow2.f32 %v2333_v31 }
0x10d3   :  { %v2396_v19 = vsel %vm627_vm0, %v2386_v18, 0.0  ;;  %v2335_v33 = vmul.f32 1.442695, %v2321_v30  ;;  %v2283_v39 = vpop.xlane.xlu0 %2282  ;;  %v2329_v55 = vadd.f32 1.0, %v2321_v30  ;;  %vm2325_vm9 = vcmp.gt.f32.partialorder %v2321_v30, 0.0 }
0x10d4   :  { %2397 = vadd.xlane.f32.xlu0 %v2396_v19  ;;  %2394 = vadd.xlane.f32.xlu1 %v2393_v17  ;;  %v2274_v35 = vpop.xlane.xlu1 %2273  ;;  %v2292_v0 = vadd.f32 %v2572_v36, %v2283_v39 }
0x10d5   :  { %3103 = vpow2.f32 %v2335_v33  ;;  %v2289_v40 = vadd.f32 %v2572_v36, %v2274_v35 }
0x10d6   :  { %3105 = vpow2.f32 %v2337_v34 }
0x10d8   :  { %v2280_v44 = vpop.xlane.xlu1 %2279 }
0x10d9   :  { %v2291_v63 = vadd.f32 %v2572_v36, %v2280_v44 }
0x10de   :  { %v3100_v41 = vpop.eup %3099 }
0x10df   :  { %v2339_v49 = vsel %vm2323_vm7, %v2327_v42, %v3100_v41  ;;  %v3102_v52 = vpop.eup %3101 }
0x10e0   :  { %v2340_v38 = vsel %vm2324_vm8, %v2328_v61, %v3102_v52 }
0x10e2   :  { %v3104_v10 = vpop.eup %3103 }
0x10e3   :  { %v2341_v9 = vsel %vm2325_vm9, %v2329_v55, %v3104_v10  ;;  %v3106_v2 = vpop.eup %3105 }
0x10e4   :  { %v2342_v60 = vsel %vm2326_vm10, %v2330_v5, %v3106_v2 }
0x1155   :  { %v2389_v43 = vpop.xlane.xlu0 %2388 }
0x1156   :  { %v2399_v46 = vadd.f32 %v2389_v43, %v2289_v40 }
0x1158   :  { %v2403_v51 = vmul.f32 %v2399_v46, %v2339_v49 }
0x1159   :  { %v2392_v59 = vpop.xlane.xlu1 %2391 }
0x115a   :  { %2413 = vperm.xlu1 %2899, %v2403_v51   ;;  %v2400_v62 = vadd.f32 %v2392_v59, %v2290_v57 }
0x115c   :  { %v2404_v48 = vmul.f32 %v2400_v62, %v2340_v38 }
0x115d   :  { %v2398_v6 = vpop.xlane.xlu0 %2397  ;;  %v2395_v27 = vpop.xlane.xlu1 %2394 }
0x115e   :  { %v2401_v1 = vadd.f32 %v2395_v27, %v2291_v63  ;;  %2418 = vperm.xlu0 %2900, %v2404_v48   ;;  %v2402_v3 = vadd.f32 %v2398_v6, %v2292_v0 }
0x1160   :  { %v2405_v4 = vmul.f32 %v2401_v1, %v2341_v9  ;;  %v2406_v56 = vmul.f32 %v2402_v3, %v2342_v60 }
0x1162   :  { %2423 = vperm.xlu1 %2899, %v2405_v4  }
0x1166   :  { %2428 = vperm.xlu1 %2899, %v2406_v56  }
0x11d5   :  { %v2414_v8 = vpop.permute.xlu1 %2413 }
0x11d6   :  { %v2431_v14 = vmul.f32 %v2414_v8, %v2407_v11 }
0x11d9   :  { %v2419_v7 = vpop.permute.xlu0 %2418 }
0x11da   :  { %v2432_v37 = vmul.f32 %v2419_v7, %v2408_v13 }
0x11dc   :  { %v2435_v58 = vadd.f32 %v2432_v37, %v2431_v14 }
0x11dd   :  { %v2424_v12 = vpop.permute.xlu1 %2423 }
0x11de   :  { %v2433_v15 = vmul.f32 %v2424_v12, %v2409_v50 }
0x11e0   :  { %v2436_v16 = vadd.f32 %v2435_v58, %v2433_v15 }
0x11e1   :  { %v2429_v47 = vpop.permute.xlu1 %2428 }
0x11e2   :  { %v2434_v18 = vmul.f32 %v2429_v47, %v2410_v54 }
0x11e4   :  { %v2437_v19 = vadd.f32 %v2436_v16, %v2434_v18 }
0x11e6   :  { %v2438_v17 = vrot.slane %v2437_v19, 4 }
0x11e8   :  { %v2439_v26 = vadd.f32 %v2438_v17, %v2437_v19 }
0x11ea   :  { %v2440_v21 = vrot.slane %v2439_v26, 2 }
0x11ec   :  { %v2441_v45 = vadd.f32 %v2440_v21, %v2439_v26 }
0x11ee   :  { %v2442_v22 = vrot.slane %v2441_v45, 1 }
0x11f0   :  { %v2443_v24 = vadd.f32 %v2442_v22, %v2441_v45 }
0x11f2   :  { %v2445_v25 = vadd.f32 %v2444_v23, %v2443_v24 }
0x11f4   :  { %v2449_v28 = vrot.slane %v2445_v25, %v3723_v53 }
0x11f6   :  { %2450 = vst [vmem:[%s3836_s4] sm:$0xff] %v2449_v28 }

</bundles_post_ra>
